<compile_context>
chip_gen: v5e
topology: v5e:2x2
jax: 0.10.0
libtpu: 0.0.40
codegen_flags: <defaults>
</compile_context>

<pallas_src>
import functools
import numpy as np
import jax
import jax.numpy as jnp
from jax.experimental import pallas as pl
from jax.experimental.pallas import tpu as pltpu

PAD_INDEX = 0  # config.pad_index


# ----------------------------------------------------------------------------
# Sinusoid positional table (matches the PyTorch helper exactly)
# ----------------------------------------------------------------------------
def get_sinusoid_encoding_table(n_position, d_hid, padding_idx=None):
    exponents = np.array([2 * (i // 2) / d_hid for i in range(d_hid)])
    pow_table = np.power(10000.0, exponents)
    sinusoid_table = np.array([pos / pow_table for pos in range(n_position)])
    sinusoid_table[:, 0::2] = np.sin(sinusoid_table[:, 0::2])
    sinusoid_table[:, 1::2] = np.cos(sinusoid_table[:, 1::2])
    if padding_idx is not None:
        sinusoid_table[padding_idx] = 0.0
    return jnp.asarray(sinusoid_table, dtype=jnp.float32)


# ----------------------------------------------------------------------------
# Pallas kernel: one encoder layer, one (batch, query-tile) grid step
# ----------------------------------------------------------------------------
def _layer_norm(x, g, b, eps=1e-5):
    # f32 statistics, matches torch.nn.LayerNorm (biased variance, eps=1e-5)
    mu = jnp.mean(x, axis=-1, keepdims=True)
    var = jnp.mean((x - mu) ** 2, axis=-1, keepdims=True)
    return (x - mu) * jax.lax.rsqrt(var + eps) * g + b


# packed (1, D) parameter rows (see prepare_layer_params)
_ROW_BO, _ROW_LN1G, _ROW_LN1B, _ROW_B2, _ROW_LN2G, _ROW_LN2B = range(6)


def encoder_layer_kernel(*refs, n_head, d_k, tq, collect_attn):
    if collect_attn:
        (x_ref, mask_ref, wqkv_ref, bqkv_ref, wo_ref,
         w1_ref, b1_ref, w2_ref, vec_ref,
         out_ref, attn_ref, qkv_sc, ctx_sc) = refs
    else:
        (x_ref, mask_ref, wqkv_ref, bqkv_ref, wo_ref,
         w1_ref, b1_ref, w2_ref, vec_ref,
         out_ref, qkv_sc, ctx_sc) = refs
        attn_ref = None

    f32, bf16 = jnp.float32, jnp.bfloat16
    H, dk = n_head, d_k
    D = ctx_sc.shape[-1]
    L = qkv_sc.shape[0]
    qi = pl.program_id(1)

    # ---- fused full-width QKV projection: once per batch element, cached in VMEM ----
    @pl.when(qi == 0)
    def _project_qkv():
        for ch in range(L // tq):                                   # static chunk loop
            x_c = x_ref[0, ch * tq:(ch + 1) * tq, :].astype(bf16)   # (tq, D)
            qkv = jnp.dot(x_c, wqkv_ref[...],
                          preferred_element_type=f32) + bqkv_ref[...]
            qkv_sc[ch * tq:(ch + 1) * tq, :] = qkv.astype(bf16)     # (tq, 3D)

    # ---- residual / query rows for this tile (dynamic row slice of the resident block) --
    q_start = pl.multiple_of(qi * tq, tq)
    x_q = x_ref[0, pl.ds(q_start, tq), :]                           # (tq, D) f32 residual
    mask_bias = mask_ref[0]                                         # (1, L) additive bias

    # ---- per-head attention core (scores / softmax / context) ----
    attn_acc = jnp.zeros((tq, L), f32) if attn_ref is not None else None
    for h in range(H):
        q_h = qkv_sc[pl.ds(q_start, tq), h * dk:(h + 1) * dk]               # (tq, dk)
        k_h = qkv_sc[:, D + h * dk:D + (h + 1) * dk]                        # (L, dk)
        v_h = qkv_sc[:, 2 * D + h * dk:2 * D + (h + 1) * dk]                # (L, dk)

        s = jax.lax.dot_general(q_h, k_h, (((1,), (1,)), ((), ())),
                                preferred_element_type=f32)                 # (tq, L)
        s = s + mask_bias
        m = jnp.max(s, axis=-1, keepdims=True)
        e = jnp.exp(s - m)
        denom = jnp.sum(e, axis=-1, keepdims=True)
        p = e * pl.reciprocal(denom, approx=True)                           # (tq, L) f32

        ctx_h = jnp.dot(p.astype(bf16), v_h, preferred_element_type=f32)    # (tq, dk)
        ctx_sc[:, h * dk:(h + 1) * dk] = ctx_h.astype(bf16)
        if attn_acc is not None:
            attn_acc = attn_acc + p

    # ---- full-width output projection + residual + LayerNorm ----
    attn_out = jnp.dot(ctx_sc[...], wo_ref[...],
                       preferred_element_type=f32) + vec_ref[_ROW_BO:_ROW_BO + 1, :]
    h1 = _layer_norm(attn_out + x_q,
                     vec_ref[_ROW_LN1G:_ROW_LN1G + 1, :],
                     vec_ref[_ROW_LN1B:_ROW_LN1B + 1, :])

    # ---- position-wise FFN + residual + LayerNorm ----
    f = jnp.dot(h1.astype(bf16), w1_ref[...],
                preferred_element_type=f32) + b1_ref[...]
    f = jnp.maximum(f, 0.0)                                                 # ReLU
    f2 = jnp.dot(f.astype(bf16), w2_ref[...],
                 preferred_element_type=f32) + vec_ref[_ROW_B2:_ROW_B2 + 1, :]
    out = _layer_norm(f2 + h1,
                      vec_ref[_ROW_LN2G:_ROW_LN2G + 1, :],
                      vec_ref[_ROW_LN2B:_ROW_LN2B + 1, :])

    out_ref[0] = out.astype(out_ref.dtype)
    if attn_ref is not None:
        attn_ref[0] = (attn_acc * (1.0 / H)).astype(attn_ref.dtype)


# ----------------------------------------------------------------------------
# Wrapper: parameter prep (QKV fusion, scale fold, bf16 cast) + pallas_call
# ----------------------------------------------------------------------------
def prepare_layer_params(p, n_head):
    """Pack PyTorch-layout params into the kernel layout (one-time, outside the kernel)."""
    D = p["wq"].shape[0]
    dk = D // n_head
    scale = jnp.float32(1.0 / np.sqrt(dk))
    bf16, f32 = jnp.bfloat16, jnp.float32

    wqkv = jnp.concatenate([p["wq"] * scale, p["wk"], p["wv"]], axis=1).astype(bf16)   # (D, 3D)
    bqkv = jnp.concatenate([p["bq"] * scale, p["bk"], p["bv"]], axis=1).astype(f32)    # (1, 3D)
    vecs = jnp.concatenate([p["bo"], p["ln1_g"], p["ln1_b"],
                            p["b2"], p["ln2_g"], p["ln2_b"]], axis=0).astype(f32)      # (6, D)
    return dict(
        wqkv=wqkv, bqkv=bqkv,
        wo=p["wo"].astype(bf16),
        w1=p["w1"].astype(bf16), b1=p["b1"].astype(f32),
        w2=p["w2"].astype(bf16),
        vecs=vecs,
    )


def _choose_tq(L, tq):
    if tq is None:
        # target 256 (matches v6e/v7x MXU rows); fall back to smaller divisors
        for cand in (256, 128, 64, 32, 16, 8):
            if L % cand == 0:
                return cand
        return L
    tq = min(tq, L)
    assert L % tq == 0, "query tile must divide sequence length"
    return tq


def _vmem_limit_bytes(L, D, d_inner, tq):
    f32, bf16 = 4, 2
    est = 0
    est += 2 * L * D * f32                                    # x block (double-buffered)
    est += 2 * L * f32                                        # mask bias
    est += 2 * tq * D * f32                                   # output tile
    est += 2 * tq * L * bf16                                  # attn tile
    est += 2 * (3 * D * D + D * D + 2 * D * d_inner) * bf16   # weights (double-buffered)
    est += 2 * (3 * D + d_inner + 6 * D) * f32                # biases / LN params
    est += (3 * L * D + tq * D) * bf16                        # VMEM scratch
    est += 6 * tq * L * f32 + 2 * tq * d_inner * f32 + 8 * tq * D * f32   # live-value slack
    return int(min(max(est * 1.25, 16 * 2 ** 20), 100 * 2 ** 20))


def encoder_layer_pallas(x, mask_bias, pp, n_head, tq=None, collect_attn=True):
    B, L, D = x.shape
    assert D % n_head == 0
    dk = D // n_head
    d_inner = pp["w1"].shape[1]
    tq = _choose_tq(L, tq)
    assert tq == L or tq % 8 == 0, "query tile must be a multiple of 8 (or the full length)"
    nq = L // tq

    const2d = lambda shape: pl.BlockSpec(shape, lambda b, q: (0, 0))
    in_specs = [
        pl.BlockSpec((1, L, D), lambda b, q: (b, 0, 0)),   # x: one resident block per batch elem
        pl.BlockSpec((1, 1, L), lambda b, q: (b, 0, 0)),   # additive pad-mask bias [B,1,L]
        const2d((D, 3 * D)),                               # fused W_QKV (Q columns pre-scaled)
        const2d((1, 3 * D)),                               # fused b_QKV
        const2d((D, D)),                                   # W_O
        const2d((D, d_inner)),                             # FFN W1
        const2d((1, d_inner)),                             # FFN b1
        const2d((d_inner, D)),                             # FFN W2
        const2d((6, D)),                                   # packed b_O, LN1 g/b, b2, LN2 g/b
    ]
    out_spec_x = pl.BlockSpec((1, tq, D), lambda b, q: (b, q, 0))
    out_shape_x = jax.ShapeDtypeStruct((B, L, D), jnp.float32)
    if collect_attn:
        out_specs = (out_spec_x, pl.BlockSpec((1, tq, L), lambda b, q: (b, q, 0)))
        out_shape = (out_shape_x, jax.ShapeDtypeStruct((B, L, L), jnp.bfloat16))
    else:
        out_specs = out_spec_x
        out_shape = out_shape_x

    scratch_shapes = [
        pltpu.VMEM((L, 3 * D), jnp.bfloat16),   # cached fused QKV projection (per batch elem)
        pltpu.VMEM((tq, D), jnp.bfloat16),      # per-tile context (heads merged for W_O matmul)
    ]

    kernel = functools.partial(encoder_layer_kernel, n_head=n_head, d_k=dk,
                               tq=tq, collect_attn=collect_attn)
    res = pl.pallas_call(
        kernel,
        grid=(B, nq),
        in_specs=in_specs,
        out_specs=out_specs,
        out_shape=out_shape,
        scratch_shapes=scratch_shapes,
        compiler_params=pltpu.CompilerParams(
            # batch is parallel (feeds both v7x TensorCores when B>=2); the query-tile
            # axis must stay sequential because the QKV scratch is filled at q==0.
            dimension_semantics=("parallel", "arbitrary"),
            vmem_limit_bytes=_vmem_limit_bytes(L, D, d_inner, tq),
        ),
    )(x, mask_bias, pp["wqkv"], pp["bqkv"], pp["wo"],
      pp["w1"], pp["b1"], pp["w2"], pp["vecs"])

    if collect_attn:
        return res[0], res[1]
    return res, None


# ----------------------------------------------------------------------------
# Full encoder forward (embedding + N layers)
# ----------------------------------------------------------------------------
def encoder_forward(src_seq, word_emb, pos_table, layer_params, n_head,
                    tq=None, collect_attn=True):
    B, L = src_seq.shape
    # Embedding: word lookup + sinusoid positional (broadcast over batch)
    x = word_emb[src_seq] + pos_table[:L][None, :, :]
    # Additive pad-mask bias computed ONCE in the wrapper: [B, 1, L], -1e9 on pad keys
    mask_bias = jnp.where(src_seq == PAD_INDEX, -1e9, 0.0).astype(jnp.float32)[:, None, :]
    attn_list = []
    for p in layer_params:
        pp = prepare_layer_params(p, n_head)
        x, attn = encoder_layer_pallas(x, mask_bias, pp, n_head, tq=tq,
                                       collect_attn=collect_attn)
        attn_list.append(attn)
    return x, attn_list


# ----------------------------------------------------------------------------
# Pure-JAX reference (same math / precision discipline) for a correctness check
# ----------------------------------------------------------------------------
def _ln_ref(y, g, b, eps=1e-5):
    mu = jnp.mean(y, -1, keepdims=True)
    var = jnp.mean((y - mu) ** 2, -1, keepdims=True)
    return (y - mu) / jnp.sqrt(var + eps) * g + b


def encoder_layer_ref(x, pad_mask, p, n_head):
    B, L, D = x.shape
    dk = D // n_head
    f32, bf16 = jnp.float32, jnp.bfloat16
    scale = 1.0 / np.sqrt(dk)

    def lin(v, w, b=None):
        out = jnp.einsum('bld,df->blf', v.astype(bf16), w.astype(bf16),
                         preferred_element_type=f32)
        return out if b is None else out + b

    q = lin(x, p["wq"] * scale, p["bq"] * scale)
    k = lin(x, p["wk"], p["bk"])
    v = lin(x, p["wv"], p["bv"])

    def split(t):  # (B, L, D) -> (B, H, L, dk)
        return t.reshape(B, L, n_head, dk).transpose(0, 2, 1, 3)

    qh, kh, vh = split(q), split(k), split(v)
    s = jnp.einsum('bhqd,bhkd->bhqk', qh.astype(bf16), kh.astype(bf16),
                   preferred_element_type=f32)
    s = jnp.where(pad_mask[:, None, None, :], -1e9, s)        # masked_fill semantics
    attn = jax.nn.softmax(s, axis=-1)
    ctx = jnp.einsum('bhqk,bhkd->bhqd', attn.astype(bf16), vh.astype(bf16),
                     preferred_element_type=f32)
    ctx = ctx.transpose(0, 2, 1, 3).reshape(B, L, D)
    attn_out = lin(ctx, p["wo"], p["bo"])
    h1 = _ln_ref(attn_out + x, p["ln1_g"], p["ln1_b"])
    f = jnp.maximum(lin(h1, p["w1"], p["b1"]), 0.0)
    f2 = lin(f, p["w2"], p["b2"])
    out = _ln_ref(f2 + h1, p["ln2_g"], p["ln2_b"])
    return out, jnp.mean(attn, axis=1)


# ----------------------------------------------------------------------------
# Deterministic parameter init (PyTorch nn.Linear-style layout)
# ----------------------------------------------------------------------------
def init_layer_params(key, d_model, d_inner):
    ks = jax.random.split(key, 12)

    def lin(kw, kb, fi, fo):
        bound = 1.0 / np.sqrt(fi)
        w = jax.random.uniform(kw, (fi, fo), jnp.float32, -bound, bound)
        b = jax.random.uniform(kb, (1, fo), jnp.float32, -bound, bound)
        return w, b

    wq, bq = lin(ks[0], ks[1], d_model, d_model)
    wk, bk = lin(ks[2], ks[3], d_model, d_model)
    wv, bv = lin(ks[4], ks[5], d_model, d_model)
    wo, bo = lin(ks[6], ks[7], d_model, d_model)
    w1, b1 = lin(ks[8], ks[9], d_model, d_inner)
    w2, b2 = lin(ks[10], ks[11], d_inner, d_model)
    return dict(
        wq=wq, bq=bq, wk=wk, bk=bk, wv=wv, bv=bv, wo=wo, bo=bo,
        ln1_g=jnp.ones((1, d_model), jnp.float32), ln1_b=jnp.zeros((1, d_model), jnp.float32),
        w1=w1, b1=b1, w2=w2, b2=b2,
        ln2_g=jnp.ones((1, d_model), jnp.float32), ln2_b=jnp.zeros((1, d_model), jnp.float32),
    )


if __name__ == "__main__":
    # Small config; TQ < L so the cached-QKV / query-tiling path is exercised (grid (2, 2)).
    n_vocab, max_seq_len = 50, 64
    n_layer, n_head, d_model, d_inner = 2, 4, 32, 64
    B, L, TQ = 2, 32, 16

    root = jax.random.PRNGKey(0)
    k_emb, k_seq, k_layers = jax.random.split(root, 3)

    word_emb = 0.1 * jax.random.normal(k_emb, (n_vocab, d_model), jnp.float32)
    pos_table = get_sinusoid_encoding_table(max_seq_len, d_model)
    layer_params = [init_layer_params(jax.random.fold_in(k_layers, i), d_model, d_inner)
                    for i in range(n_layer)]

    # Token ids in [1, n_vocab); pad some tail positions (= PAD_INDEX) to exercise the mask.
    src_seq = jax.random.randint(k_seq, (B, L), 1, n_vocab, dtype=jnp.int32)
    src_seq = src_seq.at[0, -5:].set(PAD_INDEX)
    src_seq = src_seq.at[1, -9:].set(PAD_INDEX)

    enc_out, attn_list = encoder_forward(src_seq, word_emb, pos_table, layer_params,
                                         n_head, tq=TQ, collect_attn=True)
    enc_out = jax.block_until_ready(enc_out)
    attn_list = [jax.block_until_ready(a) for a in attn_list]

    # Reference check (pure JAX, same precision discipline: bf16 matmuls, f32 softmax/LN)
    x_ref = word_emb[src_seq] + pos_table[:L][None, :, :]
    pad_mask = (src_seq == PAD_INDEX)
    attn_ref_list = []
    for p in layer_params:
        x_ref, a_ref = encoder_layer_ref(x_ref, pad_mask, p, n_head)
        attn_ref_list.append(a_ref)

    assert bool(jnp.all(jnp.isfinite(enc_out)))
    np.testing.assert_allclose(np.asarray(enc_out), np.asarray(x_ref), rtol=2e-2, atol=2e-2)
    for a, ar in zip(attn_list, attn_ref_list):
        np.testing.assert_allclose(np.asarray(a.astype(jnp.float32)), np.asarray(ar),
                                   rtol=3e-2, atol=2e-2)

    print("KERNEL_OK")
</pallas_src>

<mosaic_0001>
module attributes {stable_mosaic.version = 11 : i64} {
  func.func @encoder_layer_kernel(%arg0: i32, %arg1: i32, %arg2: memref<1x32x32xf32, #tpu.memory_space<vmem>>, %arg3: memref<1x1x32xf32, #tpu.memory_space<vmem>>, %arg4: memref<32x96xbf16, #tpu.memory_space<vmem>>, %arg5: memref<1x96xf32, #tpu.memory_space<vmem>>, %arg6: memref<32x32xbf16, #tpu.memory_space<vmem>>, %arg7: memref<32x64xbf16, #tpu.memory_space<vmem>>, %arg8: memref<1x64xf32, #tpu.memory_space<vmem>>, %arg9: memref<64x32xbf16, #tpu.memory_space<vmem>>, %arg10: memref<6x32xf32, #tpu.memory_space<vmem>>, %arg11: memref<1x16x32xf32, #tpu.memory_space<vmem>>, %arg12: memref<1x16x32xbf16, #tpu.memory_space<vmem>>, %arg13: memref<32x96xbf16, #tpu.memory_space<vmem>>, %arg14: memref<16x32xbf16, #tpu.memory_space<vmem>>) attributes {dimension_semantics = [#tpu.dimension_semantics<parallel>, #tpu.dimension_semantics<arbitrary>], iteration_bounds = array<i64: 2, 2>, scalar_prefetch = 0 : i64, scratch_operands = 2 : i64, tpu.core_type = #tpu.core_type<tc>, window_params = [{transform_indices = @transform_0, window_bounds = array<i64: 1, 32, 32>}, {transform_indices = @transform_1, window_bounds = array<i64: 1, 1, 32>}, {pipeline_mode = #tpu.pipeline_mode<synchronous>, transform_indices = @transform_2, window_bounds = array<i64: 32, 96>}, {pipeline_mode = #tpu.pipeline_mode<synchronous>, transform_indices = @transform_3, window_bounds = array<i64: 1, 96>}, {pipeline_mode = #tpu.pipeline_mode<synchronous>, transform_indices = @transform_4, window_bounds = array<i64: 32, 32>}, {pipeline_mode = #tpu.pipeline_mode<synchronous>, transform_indices = @transform_5, window_bounds = array<i64: 32, 64>}, {pipeline_mode = #tpu.pipeline_mode<synchronous>, transform_indices = @transform_6, window_bounds = array<i64: 1, 64>}, {pipeline_mode = #tpu.pipeline_mode<synchronous>, transform_indices = @transform_7, window_bounds = array<i64: 64, 32>}, {pipeline_mode = #tpu.pipeline_mode<synchronous>, transform_indices = @transform_8, window_bounds = array<i64: 6, 32>}, {transform_indices = @transform_9, window_bounds = array<i64: 1, 16, 32>}, {transform_indices = @transform_10, window_bounds = array<i64: 1, 16, 32>}]} {
    %c0_i32 = arith.constant 0 : i32
    %0 = arith.cmpi eq, %arg1, %c0_i32 : i32
    %1 = arith.extui %0 : i1 to i32
    %c0_i32_0 = arith.constant 0 : i32
    %2 = arith.cmpi ne, %1, %c0_i32_0 : i32
    scf.if %2 {
      %c0_76 = arith.constant 0 : index
      %c0_77 = arith.constant 0 : index
      %c0_78 = arith.constant 0 : index
      %178 = vector.load %arg2[%c0_76, %c0_77, %c0_78] : memref<1x32x32xf32, #tpu.memory_space<vmem>>, vector<1x16x32xf32>
      %179 = vector.shape_cast %178 : vector<1x16x32xf32> to vector<16x32xf32>
      %180 = arith.truncf %179 : vector<16x32xf32> to vector<16x32xbf16>
      %c0_79 = arith.constant 0 : index
      %c0_80 = arith.constant 0 : index
      %181 = vector.load %arg4[%c0_79, %c0_80] : memref<32x96xbf16, #tpu.memory_space<vmem>>, vector<32x96xbf16>
      %cst_81 = arith.constant dense<0.000000e+00> : vector<16x96xf32>
      %182 = tpu.matmul %180, %181, %cst_81 {dimension_numbers = #tpu.dot_dimension_numbers<[1], [0], [0], [1], [0, 0, 1, 1], [], []>} : vector<16x32xbf16>, vector<32x96xbf16>, vector<16x96xf32> -> vector<16x96xf32>
      %c0_82 = arith.constant 0 : index
      %c0_83 = arith.constant 0 : index
      %183 = vector.load %arg5[%c0_82, %c0_83] : memref<1x96xf32, #tpu.memory_space<vmem>>, vector<1x96xf32>
      %184 = vector.broadcast %183 : vector<1x96xf32> to vector<16x96xf32>
      %185 = arith.addf %182, %184 : vector<16x96xf32>
      %186 = arith.truncf %185 : vector<16x96xf32> to vector<16x96xbf16>
      %c0_84 = arith.constant 0 : index
      %c0_85 = arith.constant 0 : index
      %187 = vector.load %arg13[%c0_84, %c0_85] : memref<32x96xbf16, #tpu.memory_space<vmem>>, vector<16x96xbf16>
      tpu.vector_store %arg13[%c0_84, %c0_85], %186 {strides = array<i32>} : memref<32x96xbf16, #tpu.memory_space<vmem>>, vector<16x96xbf16>,
      %c0_86 = arith.constant 0 : index
      %c16_87 = arith.constant 16 : index
      %c0_88 = arith.constant 0 : index
      %188 = vector.load %arg2[%c0_86, %c16_87, %c0_88] : memref<1x32x32xf32, #tpu.memory_space<vmem>>, vector<1x16x32xf32>
      %189 = vector.shape_cast %188 : vector<1x16x32xf32> to vector<16x32xf32>
      %190 = arith.truncf %189 : vector<16x32xf32> to vector<16x32xbf16>
      %c0_89 = arith.constant 0 : index
      %c0_90 = arith.constant 0 : index
      %191 = vector.load %arg4[%c0_89, %c0_90] : memref<32x96xbf16, #tpu.memory_space<vmem>>, vector<32x96xbf16>
      %cst_91 = arith.constant dense<0.000000e+00> : vector<16x96xf32>
      %192 = tpu.matmul %190, %191, %cst_91 {dimension_numbers = #tpu.dot_dimension_numbers<[1], [0], [0], [1], [0, 0, 1, 1], [], []>} : vector<16x32xbf16>, vector<32x96xbf16>, vector<16x96xf32> -> vector<16x96xf32>
      %c0_92 = arith.constant 0 : index
      %c0_93 = arith.constant 0 : index
      %193 = vector.load %arg5[%c0_92, %c0_93] : memref<1x96xf32, #tpu.memory_space<vmem>>, vector<1x96xf32>
      %194 = vector.broadcast %193 : vector<1x96xf32> to vector<16x96xf32>
      %195 = arith.addf %192, %194 : vector<16x96xf32>
      %196 = arith.truncf %195 : vector<16x96xf32> to vector<16x96xbf16>
      %c16_94 = arith.constant 16 : index
      %c0_95 = arith.constant 0 : index
      %197 = vector.load %arg13[%c16_94, %c0_95] : memref<32x96xbf16, #tpu.memory_space<vmem>>, vector<16x96xbf16>
      tpu.vector_store %arg13[%c16_94, %c0_95], %196 {strides = array<i32>} : memref<32x96xbf16, #tpu.memory_space<vmem>>, vector<16x96xbf16>,
    } else {
    }
    %c16_i32 = arith.constant 16 : i32
    %3 = arith.muli %arg1, %c16_i32 : i32
    %4 = tpu.assume_multiple %3, 16 : i32
    %c0 = arith.constant 0 : index
    %5 = arith.index_cast %4 : i32 to index
    %c0_1 = arith.constant 0 : index
    %6 = vector.load %arg2[%c0, %5, %c0_1] : memref<1x32x32xf32, #tpu.memory_space<vmem>>, vector<1x16x32xf32>
    %7 = vector.shape_cast %6 : vector<1x16x32xf32> to vector<16x32xf32>
    %c0_2 = arith.constant 0 : index
    %c0_3 = arith.constant 0 : index
    %c0_4 = arith.constant 0 : index
    %8 = vector.load %arg3[%c0_2, %c0_3, %c0_4] : memref<1x1x32xf32, #tpu.memory_space<vmem>>, vector<1x1x32xf32>
    %9 = vector.shape_cast %8 : vector<1x1x32xf32> to vector<1x32xf32>
    %cst = arith.constant 0.000000e+00 : f32
    %10 = vector.broadcast %cst : f32 to vector<16x32xf32>
    %11 = arith.index_cast %4 : i32 to index
    %c0_5 = arith.constant 0 : index
    %12 = vector.load %arg13[%11, %c0_5] : memref<32x96xbf16, #tpu.memory_space<vmem>>, vector<16x8xbf16>
    %c0_6 = arith.constant 0 : index
    %c32 = arith.constant 32 : index
    %13 = vector.load %arg13[%c0_6, %c32] : memref<32x96xbf16, #tpu.memory_space<vmem>>, vector<32x8xbf16>
    %c0_7 = arith.constant 0 : index
    %c64 = arith.constant 64 : index
    %14 = vector.load %arg13[%c0_7, %c64] : memref<32x96xbf16, #tpu.memory_space<vmem>>, vector<32x8xbf16>
    %cst_8 = arith.constant dense<0.000000e+00> : vector<16x32xf32>
    %15 = tpu.matmul %12, %13, %cst_8 {dimension_numbers = #tpu.dot_dimension_numbers<[1], [1], [0], [0], [0, 0, 1, 0], [], []>} : vector<16x8xbf16>, vector<32x8xbf16>, vector<16x32xf32> -> vector<16x32xf32>
    %16 = vector.broadcast %9 : vector<1x32xf32> to vector<16x32xf32>
    %17 = arith.addf %15, %16 : vector<16x32xf32>
    %cst_9 = arith.constant dense<0xFF800000> : vector<16xf32>
    %18 = vector.multi_reduction <maximumf>, %17, %cst_9 [1] : vector<16x32xf32> to vector<16xf32>
    %19 = vector.shape_cast %18 : vector<16xf32> to vector<16x1xf32>
    %20 = vector.broadcast %19 : vector<16x1xf32> to vector<16x32xf32>
    %21 = arith.subf %17, %20 : vector<16x32xf32>
    %22 = math.exp %21 : vector<16x32xf32>
    %cst_10 = arith.constant dense<0.000000e+00> : vector<16xf32>
    %23 = vector.multi_reduction <add>, %22, %cst_10 [1] : vector<16x32xf32> to vector<16xf32>
    %24 = vector.shape_cast %23 : vector<16xf32> to vector<16x1xf32>
    %25 = tpu.reciprocal %24 {approx = true} : vector<16x1xf32> -> vector<16x1xf32>
    %26 = vector.broadcast %25 : vector<16x1xf32> to vector<16x32xf32>
    %27 = arith.mulf %22, %26 : vector<16x32xf32>
    %28 = arith.truncf %27 : vector<16x32xf32> to vector<16x32xbf16>
    %cst_11 = arith.constant dense<0.000000e+00> : vector<16x8xf32>
    %29 = tpu.matmul %28, %14, %cst_11 {dimension_numbers = #tpu.dot_dimension_numbers<[1], [0], [0], [1], [0, 0, 1, 1], [], []>} : vector<16x32xbf16>, vector<32x8xbf16>, vector<16x8xf32> -> vector<16x8xf32>
    %30 = arith.truncf %29 : vector<16x8xf32> to vector<16x8xbf16>
    %c0_12 = arith.constant 0 : index
    %c0_13 = arith.constant 0 : index
    %31 = vector.load %arg14[%c0_12, %c0_13] : memref<16x32xbf16, #tpu.memory_space<vmem>>, vector<16x8xbf16>
    tpu.vector_store %arg14[%c0_12, %c0_13], %30 {strides = array<i32>} : memref<16x32xbf16, #tpu.memory_space<vmem>>, vector<16x8xbf16>,
    %32 = arith.addf %10, %27 : vector<16x32xf32>
    %33 = arith.index_cast %4 : i32 to index
    %c8 = arith.constant 8 : index
    %34 = vector.load %arg13[%33, %c8] : memref<32x96xbf16, #tpu.memory_space<vmem>>, vector<16x8xbf16>
    %c0_14 = arith.constant 0 : index
    %c40 = arith.constant 40 : index
    %35 = vector.load %arg13[%c0_14, %c40] : memref<32x96xbf16, #tpu.memory_space<vmem>>, vector<32x8xbf16>
    %c0_15 = arith.constant 0 : index
    %c72 = arith.constant 72 : index
    %36 = vector.load %arg13[%c0_15, %c72] : memref<32x96xbf16, #tpu.memory_space<vmem>>, vector<32x8xbf16>
    %cst_16 = arith.constant dense<0.000000e+00> : vector<16x32xf32>
    %37 = tpu.matmul %34, %35, %cst_16 {dimension_numbers = #tpu.dot_dimension_numbers<[1], [1], [0], [0], [0, 0, 1, 0], [], []>} : vector<16x8xbf16>, vector<32x8xbf16>, vector<16x32xf32> -> vector<16x32xf32>
    %38 = vector.broadcast %9 : vector<1x32xf32> to vector<16x32xf32>
    %39 = arith.addf %37, %38 : vector<16x32xf32>
    %cst_17 = arith.constant dense<0xFF800000> : vector<16xf32>
    %40 = vector.multi_reduction <maximumf>, %39, %cst_17 [1] : vector<16x32xf32> to vector<16xf32>
    %41 = vector.shape_cast %40 : vector<16xf32> to vector<16x1xf32>
    %42 = vector.broadcast %41 : vector<16x1xf32> to vector<16x32xf32>
    %43 = arith.subf %39, %42 : vector<16x32xf32>
    %44 = math.exp %43 : vector<16x32xf32>
    %cst_18 = arith.constant dense<0.000000e+00> : vector<16xf32>
    %45 = vector.multi_reduction <add>, %44, %cst_18 [1] : vector<16x32xf32> to vector<16xf32>
    %46 = vector.shape_cast %45 : vector<16xf32> to vector<16x1xf32>
    %47 = tpu.reciprocal %46 {approx = true} : vector<16x1xf32> -> vector<16x1xf32>
    %48 = vector.broadcast %47 : vector<16x1xf32> to vector<16x32xf32>
    %49 = arith.mulf %44, %48 : vector<16x32xf32>
    %50 = arith.truncf %49 : vector<16x32xf32> to vector<16x32xbf16>
    %cst_19 = arith.constant dense<0.000000e+00> : vector<16x8xf32>
    %51 = tpu.matmul %50, %36, %cst_19 {dimension_numbers = #tpu.dot_dimension_numbers<[1], [0], [0], [1], [0, 0, 1, 1], [], []>} : vector<16x32xbf16>, vector<32x8xbf16>, vector<16x8xf32> -> vector<16x8xf32>
    %52 = arith.truncf %51 : vector<16x8xf32> to vector<16x8xbf16>
    %c0_20 = arith.constant 0 : index
    %c8_21 = arith.constant 8 : index
    %53 = vector.load %arg14[%c0_20, %c8_21] : memref<16x32xbf16, #tpu.memory_space<vmem>>, vector<16x8xbf16>
    tpu.vector_store %arg14[%c0_20, %c8_21], %52 {strides = array<i32>} : memref<16x32xbf16, #tpu.memory_space<vmem>>, vector<16x8xbf16>,
    %54 = arith.addf %32, %49 : vector<16x32xf32>
    %55 = arith.index_cast %4 : i32 to index
    %c16 = arith.constant 16 : index
    %56 = vector.load %arg13[%55, %c16] : memref<32x96xbf16, #tpu.memory_space<vmem>>, vector<16x8xbf16>
    %c0_22 = arith.constant 0 : index
    %c48 = arith.constant 48 : index
    %57 = vector.load %arg13[%c0_22, %c48] : memref<32x96xbf16, #tpu.memory_space<vmem>>, vector<32x8xbf16>
    %c0_23 = arith.constant 0 : index
    %c80 = arith.constant 80 : index
    %58 = vector.load %arg13[%c0_23, %c80] : memref<32x96xbf16, #tpu.memory_space<vmem>>, vector<32x8xbf16>
    %cst_24 = arith.constant dense<0.000000e+00> : vector<16x32xf32>
    %59 = tpu.matmul %56, %57, %cst_24 {dimension_numbers = #tpu.dot_dimension_numbers<[1], [1], [0], [0], [0, 0, 1, 0], [], []>} : vector<16x8xbf16>, vector<32x8xbf16>, vector<16x32xf32> -> vector<16x32xf32>
    %60 = vector.broadcast %9 : vector<1x32xf32> to vector<16x32xf32>
    %61 = arith.addf %59, %60 : vector<16x32xf32>
    %cst_25 = arith.constant dense<0xFF800000> : vector<16xf32>
    %62 = vector.multi_reduction <maximumf>, %61, %cst_25 [1] : vector<16x32xf32> to vector<16xf32>
    %63 = vector.shape_cast %62 : vector<16xf32> to vector<16x1xf32>
    %64 = vector.broadcast %63 : vector<16x1xf32> to vector<16x32xf32>
    %65 = arith.subf %61, %64 : vector<16x32xf32>
    %66 = math.exp %65 : vector<16x32xf32>
    %cst_26 = arith.constant dense<0.000000e+00> : vector<16xf32>
    %67 = vector.multi_reduction <add>, %66, %cst_26 [1] : vector<16x32xf32> to vector<16xf32>
    %68 = vector.shape_cast %67 : vector<16xf32> to vector<16x1xf32>
    %69 = tpu.reciprocal %68 {approx = true} : vector<16x1xf32> -> vector<16x1xf32>
    %70 = vector.broadcast %69 : vector<16x1xf32> to vector<16x32xf32>
    %71 = arith.mulf %66, %70 : vector<16x32xf32>
    %72 = arith.truncf %71 : vector<16x32xf32> to vector<16x32xbf16>
    %cst_27 = arith.constant dense<0.000000e+00> : vector<16x8xf32>
    %73 = tpu.matmul %72, %58, %cst_27 {dimension_numbers = #tpu.dot_dimension_numbers<[1], [0], [0], [1], [0, 0, 1, 1], [], []>} : vector<16x32xbf16>, vector<32x8xbf16>, vector<16x8xf32> -> vector<16x8xf32>
    %74 = arith.truncf %73 : vector<16x8xf32> to vector<16x8xbf16>
    %c0_28 = arith.constant 0 : index
    %c16_29 = arith.constant 16 : index
    %75 = vector.load %arg14[%c0_28, %c16_29] : memref<16x32xbf16, #tpu.memory_space<vmem>>, vector<16x8xbf16>
    tpu.vector_store %arg14[%c0_28, %c16_29], %74 {strides = array<i32>} : memref<16x32xbf16, #tpu.memory_space<vmem>>, vector<16x8xbf16>,
    %76 = arith.addf %54, %71 : vector<16x32xf32>
    %77 = arith.index_cast %4 : i32 to index
    %c24 = arith.constant 24 : index
    %78 = vector.load %arg13[%77, %c24] : memref<32x96xbf16, #tpu.memory_space<vmem>>, vector<16x8xbf16>
    %c0_30 = arith.constant 0 : index
    %c56 = arith.constant 56 : index
    %79 = vector.load %arg13[%c0_30, %c56] : memref<32x96xbf16, #tpu.memory_space<vmem>>, vector<32x8xbf16>
    %c0_31 = arith.constant 0 : index
    %c88 = arith.constant 88 : index
    %80 = vector.load %arg13[%c0_31, %c88] : memref<32x96xbf16, #tpu.memory_space<vmem>>, vector<32x8xbf16>
    %cst_32 = arith.constant dense<0.000000e+00> : vector<16x32xf32>
    %81 = tpu.matmul %78, %79, %cst_32 {dimension_numbers = #tpu.dot_dimension_numbers<[1], [1], [0], [0], [0, 0, 1, 0], [], []>} : vector<16x8xbf16>, vector<32x8xbf16>, vector<16x32xf32> -> vector<16x32xf32>
    %82 = vector.broadcast %9 : vector<1x32xf32> to vector<16x32xf32>
    %83 = arith.addf %81, %82 : vector<16x32xf32>
    %cst_33 = arith.constant dense<0xFF800000> : vector<16xf32>
    %84 = vector.multi_reduction <maximumf>, %83, %cst_33 [1] : vector<16x32xf32> to vector<16xf32>
    %85 = vector.shape_cast %84 : vector<16xf32> to vector<16x1xf32>
    %86 = vector.broadcast %85 : vector<16x1xf32> to vector<16x32xf32>
    %87 = arith.subf %83, %86 : vector<16x32xf32>
    %88 = math.exp %87 : vector<16x32xf32>
    %cst_34 = arith.constant dense<0.000000e+00> : vector<16xf32>
    %89 = vector.multi_reduction <add>, %88, %cst_34 [1] : vector<16x32xf32> to vector<16xf32>
    %90 = vector.shape_cast %89 : vector<16xf32> to vector<16x1xf32>
    %91 = tpu.reciprocal %90 {approx = true} : vector<16x1xf32> -> vector<16x1xf32>
    %92 = vector.broadcast %91 : vector<16x1xf32> to vector<16x32xf32>
    %93 = arith.mulf %88, %92 : vector<16x32xf32>
    %94 = arith.truncf %93 : vector<16x32xf32> to vector<16x32xbf16>
    %cst_35 = arith.constant dense<0.000000e+00> : vector<16x8xf32>
    %95 = tpu.matmul %94, %80, %cst_35 {dimension_numbers = #tpu.dot_dimension_numbers<[1], [0], [0], [1], [0, 0, 1, 1], [], []>} : vector<16x32xbf16>, vector<32x8xbf16>, vector<16x8xf32> -> vector<16x8xf32>
    %96 = arith.truncf %95 : vector<16x8xf32> to vector<16x8xbf16>
    %c0_36 = arith.constant 0 : index
    %c24_37 = arith.constant 24 : index
    %97 = vector.load %arg14[%c0_36, %c24_37] : memref<16x32xbf16, #tpu.memory_space<vmem>>, vector<16x8xbf16>
    tpu.vector_store %arg14[%c0_36, %c24_37], %96 {strides = array<i32>} : memref<16x32xbf16, #tpu.memory_space<vmem>>, vector<16x8xbf16>,
    %98 = arith.addf %76, %93 : vector<16x32xf32>
    %c0_38 = arith.constant 0 : index
    %c0_39 = arith.constant 0 : index
    %99 = vector.load %arg14[%c0_38, %c0_39] : memref<16x32xbf16, #tpu.memory_space<vmem>>, vector<16x32xbf16>
    %c0_40 = arith.constant 0 : index
    %c0_41 = arith.constant 0 : index
    %100 = vector.load %arg6[%c0_40, %c0_41] : memref<32x32xbf16, #tpu.memory_space<vmem>>, vector<32x32xbf16>
    %cst_42 = arith.constant dense<0.000000e+00> : vector<16x32xf32>
    %101 = tpu.matmul %99, %100, %cst_42 {dimension_numbers = #tpu.dot_dimension_numbers<[1], [0], [0], [1], [0, 0, 1, 1], [], []>} : vector<16x32xbf16>, vector<32x32xbf16>, vector<16x32xf32> -> vector<16x32xf32>
    %c0_43 = arith.constant 0 : index
    %c0_44 = arith.constant 0 : index
    %102 = vector.load %arg10[%c0_43, %c0_44] : memref<6x32xf32, #tpu.memory_space<vmem>>, vector<1x32xf32>
    %103 = vector.broadcast %102 : vector<1x32xf32> to vector<16x32xf32>
    %104 = arith.addf %101, %103 : vector<16x32xf32>
    %105 = arith.addf %104, %7 : vector<16x32xf32>
    %c1 = arith.constant 1 : index
    %c0_45 = arith.constant 0 : index
    %106 = vector.load %arg10[%c1, %c0_45] : memref<6x32xf32, #tpu.memory_space<vmem>>, vector<1x32xf32>
    %c2 = arith.constant 2 : index
    %c0_46 = arith.constant 0 : index
    %107 = vector.load %arg10[%c2, %c0_46] : memref<6x32xf32, #tpu.memory_space<vmem>>, vector<1x32xf32>
    %cst_47 = arith.constant dense<0.000000e+00> : vector<16xf32>
    %108 = vector.multi_reduction <add>, %105, %cst_47 [1] : vector<16x32xf32> to vector<16xf32>
    %109 = vector.shape_cast %108 : vector<16xf32> to vector<16x1xf32>
    %cst_48 = arith.constant 3.200000e+01 : f32
    %110 = vector.broadcast %cst_48 : f32 to vector<16x1xf32>
    %111 = arith.divf %109, %110 : vector<16x1xf32>
    %112 = vector.broadcast %111 : vector<16x1xf32> to vector<16x32xf32>
    %113 = arith.subf %105, %112 : vector<16x32xf32>
    %114 = arith.mulf %113, %113 : vector<16x32xf32>
    %cst_49 = arith.constant dense<0.000000e+00> : vector<16xf32>
    %115 = vector.multi_reduction <add>, %114, %cst_49 [1] : vector<16x32xf32> to vector<16xf32>
    %116 = vector.shape_cast %115 : vector<16xf32> to vector<16x1xf32>
    %cst_50 = arith.constant 3.200000e+01 : f32
    %117 = vector.broadcast %cst_50 : f32 to vector<16x1xf32>
    %118 = arith.divf %116, %117 : vector<16x1xf32>
    %119 = vector.broadcast %111 : vector<16x1xf32> to vector<16x32xf32>
    %120 = arith.subf %105, %119 : vector<16x32xf32>
    %cst_51 = arith.constant 9.99999974E-6 : f32
    %121 = vector.broadcast %cst_51 : f32 to vector<16x1xf32>
    %122 = arith.addf %118, %121 : vector<16x1xf32>
    %123 = math.rsqrt %122 : vector<16x1xf32>
    %124 = vector.broadcast %123 : vector<16x1xf32> to vector<16x32xf32>
    %125 = arith.mulf %120, %124 : vector<16x32xf32>
    %126 = vector.broadcast %106 : vector<1x32xf32> to vector<16x32xf32>
    %127 = arith.mulf %125, %126 : vector<16x32xf32>
    %128 = vector.broadcast %107 : vector<1x32xf32> to vector<16x32xf32>
    %129 = arith.addf %127, %128 : vector<16x32xf32>
    %130 = arith.truncf %129 : vector<16x32xf32> to vector<16x32xbf16>
    %c0_52 = arith.constant 0 : index
    %c0_53 = arith.constant 0 : index
    %131 = vector.load %arg7[%c0_52, %c0_53] : memref<32x64xbf16, #tpu.memory_space<vmem>>, vector<32x64xbf16>
    %cst_54 = arith.constant dense<0.000000e+00> : vector<16x64xf32>
    %132 = tpu.matmul %130, %131, %cst_54 {dimension_numbers = #tpu.dot_dimension_numbers<[1], [0], [0], [1], [0, 0, 1, 1], [], []>} : vector<16x32xbf16>, vector<32x64xbf16>, vector<16x64xf32> -> vector<16x64xf32>
    %c0_55 = arith.constant 0 : index
    %c0_56 = arith.constant 0 : index
    %133 = vector.load %arg8[%c0_55, %c0_56] : memref<1x64xf32, #tpu.memory_space<vmem>>, vector<1x64xf32>
    %134 = vector.broadcast %133 : vector<1x64xf32> to vector<16x64xf32>
    %135 = arith.addf %132, %134 : vector<16x64xf32>
    %cst_57 = arith.constant 0.000000e+00 : f32
    %136 = vector.broadcast %cst_57 : f32 to vector<16x64xf32>
    %137 = arith.maximumf %135, %136 : vector<16x64xf32>
    %138 = arith.truncf %137 : vector<16x64xf32> to vector<16x64xbf16>
    %c0_58 = arith.constant 0 : index
    %c0_59 = arith.constant 0 : index
    %139 = vector.load %arg9[%c0_58, %c0_59] : memref<64x32xbf16, #tpu.memory_space<vmem>>, vector<64x32xbf16>
    %cst_60 = arith.constant dense<0.000000e+00> : vector<16x32xf32>
    %140 = tpu.matmul %138, %139, %cst_60 {dimension_numbers = #tpu.dot_dimension_numbers<[1], [0], [0], [1], [0, 0, 1, 1], [], []>} : vector<16x64xbf16>, vector<64x32xbf16>, vector<16x32xf32> -> vector<16x32xf32>
    %c3 = arith.constant 3 : index
    %c0_61 = arith.constant 0 : index
    %141 = vector.load %arg10[%c3, %c0_61] : memref<6x32xf32, #tpu.memory_space<vmem>>, vector<1x32xf32>
    %142 = vector.broadcast %141 : vector<1x32xf32> to vector<16x32xf32>
    %143 = arith.addf %140, %142 : vector<16x32xf32>
    %144 = arith.addf %143, %129 : vector<16x32xf32>
    %c4 = arith.constant 4 : index
    %c0_62 = arith.constant 0 : index
    %145 = vector.load %arg10[%c4, %c0_62] : memref<6x32xf32, #tpu.memory_space<vmem>>, vector<1x32xf32>
    %c5 = arith.constant 5 : index
    %c0_63 = arith.constant 0 : index
    %146 = vector.load %arg10[%c5, %c0_63] : memref<6x32xf32, #tpu.memory_space<vmem>>, vector<1x32xf32>
    %cst_64 = arith.constant dense<0.000000e+00> : vector<16xf32>
    %147 = vector.multi_reduction <add>, %144, %cst_64 [1] : vector<16x32xf32> to vector<16xf32>
    %148 = vector.shape_cast %147 : vector<16xf32> to vector<16x1xf32>
    %cst_65 = arith.constant 3.200000e+01 : f32
    %149 = vector.broadcast %cst_65 : f32 to vector<16x1xf32>
    %150 = arith.divf %148, %149 : vector<16x1xf32>
    %151 = vector.broadcast %150 : vector<16x1xf32> to vector<16x32xf32>
    %152 = arith.subf %144, %151 : vector<16x32xf32>
    %153 = arith.mulf %152, %152 : vector<16x32xf32>
    %cst_66 = arith.constant dense<0.000000e+00> : vector<16xf32>
    %154 = vector.multi_reduction <add>, %153, %cst_66 [1] : vector<16x32xf32> to vector<16xf32>
    %155 = vector.shape_cast %154 : vector<16xf32> to vector<16x1xf32>
    %cst_67 = arith.constant 3.200000e+01 : f32
    %156 = vector.broadcast %cst_67 : f32 to vector<16x1xf32>
    %157 = arith.divf %155, %156 : vector<16x1xf32>
    %158 = vector.broadcast %150 : vector<16x1xf32> to vector<16x32xf32>
    %159 = arith.subf %144, %158 : vector<16x32xf32>
    %cst_68 = arith.constant 9.99999974E-6 : f32
    %160 = vector.broadcast %cst_68 : f32 to vector<16x1xf32>
    %161 = arith.addf %157, %160 : vector<16x1xf32>
    %162 = math.rsqrt %161 : vector<16x1xf32>
    %163 = vector.broadcast %162 : vector<16x1xf32> to vector<16x32xf32>
    %164 = arith.mulf %159, %163 : vector<16x32xf32>
    %165 = vector.broadcast %145 : vector<1x32xf32> to vector<16x32xf32>
    %166 = arith.mulf %164, %165 : vector<16x32xf32>
    %167 = vector.broadcast %146 : vector<1x32xf32> to vector<16x32xf32>
    %168 = arith.addf %166, %167 : vector<16x32xf32>
    %c0_69 = arith.constant 0 : index
    %c0_70 = arith.constant 0 : index
    %c0_71 = arith.constant 0 : index
    %169 = vector.load %arg11[%c0_69, %c0_70, %c0_71] : memref<1x16x32xf32, #tpu.memory_space<vmem>>, vector<1x16x32xf32>
    %170 = vector.shape_cast %169 : vector<1x16x32xf32> to vector<16x32xf32>
    %171 = vector.shape_cast %168 : vector<16x32xf32> to vector<1x16x32xf32>
    tpu.vector_store %arg11[%c0_69, %c0_70, %c0_71], %171 {strides = array<i32>} : memref<1x16x32xf32, #tpu.memory_space<vmem>>, vector<1x16x32xf32>,
    %cst_72 = arith.constant 2.500000e-01 : f32
    %172 = vector.broadcast %cst_72 : f32 to vector<16x32xf32>
    %173 = arith.mulf %98, %172 : vector<16x32xf32>
    %174 = arith.truncf %173 : vector<16x32xf32> to vector<16x32xbf16>
    %c0_73 = arith.constant 0 : index
    %c0_74 = arith.constant 0 : index
    %c0_75 = arith.constant 0 : index
    %175 = vector.load %arg12[%c0_73, %c0_74, %c0_75] : memref<1x16x32xbf16, #tpu.memory_space<vmem>>, vector<1x16x32xbf16>
    %176 = vector.shape_cast %175 : vector<1x16x32xbf16> to vector<16x32xbf16>
    %177 = vector.shape_cast %174 : vector<16x32xbf16> to vector<1x16x32xbf16>
    tpu.vector_store %arg12[%c0_73, %c0_74, %c0_75], %177 {strides = array<i32>} : memref<1x16x32xbf16, #tpu.memory_space<vmem>>, vector<1x16x32xbf16>,
    return
  }
  func.func @transform_0(%arg0: i32, %arg1: i32) -> (i32, i32, i32) {
    %c0_i32 = arith.constant 0 : i32
    %c0_i32_0 = arith.constant 0 : i32
    %c0_i32_1 = arith.constant 0 : i32
    return %arg0, %c0_i32, %c0_i32_0 : i32, i32, i32
  }
  func.func @transform_1(%arg0: i32, %arg1: i32) -> (i32, i32, i32) {
    %c0_i32 = arith.constant 0 : i32
    %c0_i32_0 = arith.constant 0 : i32
    %c0_i32_1 = arith.constant 0 : i32
    return %arg0, %c0_i32, %c0_i32_0 : i32, i32, i32
  }
  func.func @transform_2(%arg0: i32, %arg1: i32) -> (i32, i32) {
    %c0_i32 = arith.constant 0 : i32
    %c0_i32_0 = arith.constant 0 : i32
    %c0_i32_1 = arith.constant 0 : i32
    return %c0_i32, %c0_i32_0 : i32, i32
  }
  func.func @transform_3(%arg0: i32, %arg1: i32) -> (i32, i32) {
    %c0_i32 = arith.constant 0 : i32
    %c0_i32_0 = arith.constant 0 : i32
    %c0_i32_1 = arith.constant 0 : i32
    return %c0_i32, %c0_i32_0 : i32, i32
  }
  func.func @transform_4(%arg0: i32, %arg1: i32) -> (i32, i32) {
    %c0_i32 = arith.constant 0 : i32
    %c0_i32_0 = arith.constant 0 : i32
    %c0_i32_1 = arith.constant 0 : i32
    return %c0_i32, %c0_i32_0 : i32, i32
  }
  func.func @transform_5(%arg0: i32, %arg1: i32) -> (i32, i32) {
    %c0_i32 = arith.constant 0 : i32
    %c0_i32_0 = arith.constant 0 : i32
    %c0_i32_1 = arith.constant 0 : i32
    return %c0_i32, %c0_i32_0 : i32, i32
  }
  func.func @transform_6(%arg0: i32, %arg1: i32) -> (i32, i32) {
    %c0_i32 = arith.constant 0 : i32
    %c0_i32_0 = arith.constant 0 : i32
    %c0_i32_1 = arith.constant 0 : i32
    return %c0_i32, %c0_i32_0 : i32, i32
  }
  func.func @transform_7(%arg0: i32, %arg1: i32) -> (i32, i32) {
    %c0_i32 = arith.constant 0 : i32
    %c0_i32_0 = arith.constant 0 : i32
    %c0_i32_1 = arith.constant 0 : i32
    return %c0_i32, %c0_i32_0 : i32, i32
  }
  func.func @transform_8(%arg0: i32, %arg1: i32) -> (i32, i32) {
    %c0_i32 = arith.constant 0 : i32
    %c0_i32_0 = arith.constant 0 : i32
    %c0_i32_1 = arith.constant 0 : i32
    return %c0_i32, %c0_i32_0 : i32, i32
  }
  func.func @transform_9(%arg0: i32, %arg1: i32) -> (i32, i32, i32) {
    %c0_i32 = arith.constant 0 : i32
    %c0_i32_0 = arith.constant 0 : i32
    return %arg0, %arg1, %c0_i32 : i32, i32, i32
  }
  func.func @transform_10(%arg0: i32, %arg1: i32) -> (i32, i32, i32) {
    %c0_i32 = arith.constant 0 : i32
    %c0_i32_0 = arith.constant 0 : i32
    return %arg0, %arg1, %c0_i32 : i32, i32, i32
  }
}

</mosaic_0001>

<bundles_post_ra>
// kernel: tpu_custom_call.1
= control target key start
LH: loop header
LB: loop body
LE: loop exit
PB: predicated region body
PF: predicated region fallthrough
CT: control target
= control target key end

     0   :  { %s2579_s0 = inlined_call_operand.hbm [shape: f32[2,32,32], index: 0, kind: input, shape index: {}]   ;;  %s2580_s1 = inlined_call_operand.hbm [shape: f32[2,1,32], index: 1, kind: input, shape index: {}]   ;;  %s2581_s2 = inlined_call_operand.vmem [shape: bf16[32,96], index: 2, kind: input, shape index: {}]   ;;  %s2582_s3 = inlined_call_operand.vmem [shape: f32[1,96], index: 3, kind: input, shape index: {}]   ;;  %s2583_s4 = inlined_call_operand.vmem [shape: bf16[32,32], index: 4, kind: input, shape index: {}]   ;;  %s2584_s5 = inlined_call_operand.vmem [shape: bf16[32,64], index: 5, kind: input, shape index: {}]   ;;  %s2585_s6 = inlined_call_operand.vmem [shape: f32[1,64], index: 6, kind: input, shape index: {}]   ;;  %s2586_s7 = inlined_call_operand.vmem [shape: bf16[64,32], index: 7, kind: input, shape index: {}]   ;;  %s2587_s8 = inlined_call_operand.hbm [shape: f32[6,32], index: 8, kind: input, shape index: {}]   ;;  %s2588_s9 = inlined_call_operand.hbm [shape: f32[2,32,32], index: 9, kind: output, shape index: {0}]   ;;  %s2589_s10 = inlined_call_operand.hbm [shape: bf16[2,32,32], index: 10, kind: output, shape index: {1}]  }
   0x1   :  { %2606 = sst [smem:[#allocation25_spill]] %s2579_s0 }
   0x2   :  { %2607 = sst [smem:[#allocation26_spill]] %s2580_s1 }
   0x3   :  { %2608 = sst [smem:[#allocation27_spill]] %s2581_s2 }
   0x4   :  { %2609 = sst [smem:[#allocation28_spill]] %s2582_s3 }
   0x5   :  { %2610 = sst [smem:[#allocation29_spill]] %s2583_s4 }
   0x6   :  { %2611 = sst [smem:[#allocation30_spill]] %s2584_s5 }
   0x7   :  { %2612 = sst [smem:[#allocation31_spill]] %s2585_s6 }
   0x8   :  { %2613 = sst [smem:[#allocation32_spill]] %s2586_s7 }
   0x9   :  { %2614 = sst [smem:[#allocation33_spill]] %s2587_s8 }
   0xa   :  { %2615 = sst [smem:[#allocation34_spill]] %s2588_s9 }
   0xb   :  { %2616 = sst [smem:[#allocation35_spill]] %s2589_s10 }
   0xc   :  { %16 = vsyncpa [#allocation5], 0 }
   0xd   :  { %18 = vsyncpa [#allocation5 + $0x1], 0 }
   0xe   :  { %19 = vsyncpa [#allocation8], 0 }
   0xf   :  { %21 = vsyncpa [#allocation8 + $0x1], 0 }
  0x10   :  { %22 = vsyncpa [#allocation6], 0 }
  0x11   :  { %24 = vsyncpa [#allocation6 + $0x1], 0 }
  0x12   :  { %25 = vsyncpa [#allocation12], 0 }
  0x13   :  { %27 = vsyncpa [#allocation12 + $0x1], 0  ;;  %s2145_s13 = smov 0   ;;  %s2147_s14 = smov 0  }
  0x14   :  { %s2149_s15 = smov 0   ;;  %s2151_s16 = smov 0  }
  0x15   :  { %s2153_s17 = smov 0   ;;  %s2155_s18 = smov 0  }
  0x16   :  { %s2157_s19 = smov 0   ;;  %s2159_s20 = smov 0  }
  0x17   :  { %s2161_s21 = smov 0   ;;  %s2163_s22 = smov 0  }
  0x18   :  { %s2165_s23 = smov 0  }
  0x19 LB: > { %2617 = sst [smem:[#allocation18_spill]] %s2028_s13  ;;  %s2199_s24 = sadd.s32 4294967295, %s2068_s23   ;;  %s2068_s23 = sphi %s2165_s23, %s33_s23   ;;  %s2064_s22 = sphi %s2163_s22, %s2661_s22   ;;  %s2060_s21 = sphi %s2161_s21, %s2652_s21   ;;  %s2056_s20 = sphi %s2159_s20, %s2660_s20   ;;  %s2052_s19 = sphi %s2157_s19, %s2651_s19   ;;  %s2048_s18 = sphi %s2155_s18, %s2659_s18   ;;  %s2044_s17 = sphi %s2153_s17, %s2658_s17   ;;  %s2040_s16 = sphi %s2151_s16, %s2657_s16   ;;  %s2036_s15 = sphi %s2149_s15, %s2656_s15   ;;  %s2032_s14 = sphi %s2147_s14, %s2655_s14   ;;  %s2028_s13 = sphi %s2145_s13, %s2654_s13  }
  0x1a   : > { %2618 = sst [smem:[#allocation19_spill]] %s2056_s20  ;;  %s1458_s25 = sadd.s32 4294967294, %s2068_s23  }
  0x1b   : > { %2619 = sst [smem:[#allocation20_spill]] %s2060_s21  ;;  %p59_p0 = scmp.ne.s32.totalorder %s2048_s18, %s2044_s17 }
  0x1c   : > { %p60_p1 = scmp.eq.s32.totalorder %s2068_s23, 0  ;;  %p65_p2 = scmp.ne.s32.totalorder %s2044_s17, %s2040_s16 }
  0x1d   : > { %p66_p3 = scmp.eq.s32.totalorder %s2199_s24, 0  ;;  %p263_p5 = scmp.ne.s32.totalorder %s2036_s15, %s2032_s14 }
  0x1e   : > { %p2209_p4 = por %p60_p1, %p59_p0  ;;  %p264_p7 = scmp.eq.s32.totalorder %s2199_s24, 3 }
  0x1f   : > { %p2217_p6 = por %p66_p3, %p65_p2  ;;  %p269_p8 = scmp.ne.s32.totalorder %s2032_s14, %s2028_s13 }
  0x20   : > { %p270_p9 = scmp.eq.s32.totalorder %s1458_s25, 3  ;;  %p2224_p10 = por %p264_p7, %p263_p5 }
  0x21   : > { %p1459_p11 = scmp.ge.s32.totalorder %s2068_s23, 1  ;;  %p305_p13 = scmp.lt.s32.totalorder %s2068_s23, 5 }
  0x22   : > { %s2622_s30 = scalar_select %p2224_p10, 1, 0 }
  0x23   : > { %p2229_p12 = por %p270_p9, %p269_p8  ;;  %s2626_s8 = sld [smem:[#allocation33_spill]] }
  0x24   : > { %2623 = sst [smem:[#allocation21_spill]] %s2622_s30  ;;  %p2237_p0 = pnand %p1459_p11, %p305_p13 }
  0x25   : > { %s2624_s11 = scalar_select %p2229_p12, 1, 0 }
  0x26   : > { %p1634_p1 = pneg %p2237_p0  ;;  %s2070_s25 = smov [#allocation9]  }
  0x27   : > { %2625 = sst [smem:[#allocation22_spill]] %s2624_s11  ;;  %s337_s13 = sshll.u32 %s2070_s25, 4  ;;  %s338_s13 = int_to_ptr.vmem [resolvable:$true] %s337_s13 }
  0x28   : > { %p1653_p2 = scmp.lt.s32.totalorder %s2068_s23, 4  ;;  %p1635_p5 = pnand %p1634_p1, %p66_p3 }
  0x29   : > { %s335_s27 = sshll.u32 %s2626_s8, 4  ;;  %s42_s16 = sadd.s32 1, %s2060_s21  ;;  %s336_s27 = int_to_ptr.hbm [resolvable:$true] %s335_s27 }
  0x2a   : > { %p2248_p7 = pnand %p1653_p2, %p2209_p4  ;;  %s45_s8 = sadd.s32 1, %s2064_s22 }
  0x2b   : > { %1637 = dma.hbm_to_vmem [thread:$0]  (!%p1635_p5), %s336_s27, 128, %s338_s13, [#allocation8]  }
  0x2c   : > { %p43_p8 = scmp.ge.s32.totalorder %s42_s16, 2  ;;  %s2255_s11 = sand.u32 1, %s2048_s18  }
  0x2d   : > { %s1462_s9 = sshll.u32 %s2255_s11, 5  ;;  %s1596_s13 = sshll.u32 %s2064_s22, 5 }
  0x2e   : > { %s2663_s16 = smov (%p43_p8, %s42_s16), 0  ;;  %s2665_s8 = smov (!%p43_p8, %s45_s8), %s2064_s22 }
  0x2f   : > { %2629 = sst [smem:[#allocation23_spill]] %s2663_s16  ;;  %s249_s28 = ssub.s32 %s2060_s21, %s2663_s16 }
  0x30   : > { %p47_p4 = scmp.ge.s32.totalorder %s2665_s8, 2  ;;  %s2630_s0 = sld [smem:[#allocation25_spill]] }
  0x31   : > { %s352_s30 = scalar_lea.vmem [#allocation4], %s1462_s9  ;;  %s2632_s21 = sadd.s32 1, %s2048_s18 }
  0x32   : > { %s360_s20 = sshll.u32 %s352_s30, 4  ;;  %s2667_s8 = smov (%p47_p4, %s2665_s8), 0  ;;  %s361_s20 = int_to_ptr.vmem [resolvable:$true] %s360_s20 }
  0x33   : > { %2631 = sst [smem:[#allocation24_spill]] %s2667_s8  ;;  %s49_s7 = ssub.s32 %s2064_s22, %s2667_s8 }
  0x34   : > { %p50_p9 = scmp.eq.s32.totalorder %s49_s7, 0  ;;  %s250_s16 = sor.u32 %s249_s28, %s49_s7 }
  0x35   : > { %p251_p11 = scmp.eq.s32.totalorder %s250_s16, 0  ;;  %s370_s30 = sand.u32 1, %s2068_s23  }
  0x36   : > { %s357_s10 = scalar_lea.hbm %s2630_s0, %s1596_s13  ;;  %s2633_s13 = sadd.s32 1, %s2036_s15 }
  0x37   : > { %s358_s6 = sshll.u32 %s357_s10, 4  ;;  %s349_s27 = scalar_lea.sflag [#allocation5], %s2255_s11  ;;  %s359_s6 = int_to_ptr.hbm [resolvable:$true] %s358_s6 }
  0x38   : > { %s2274_s5 = scalar_select %p50_p9, %s2048_s18, %s2632_s21  }
  0x39   : > { %s2279_s9 = scalar_select %p251_p11, %s2036_s15, %s2633_s13  }
  0x3a   : > { %s2071_s25 = smov 128   ;;  %s2072_s0 = smov 8  }
  0x3b   : > { %1641 = dma.hbm_to_vmem [thread:$0]  (!%p2248_p7), %s359_s6, 512, %s361_s20, %s349_s27, %s2071_s25, %s2071_s25, %s2072_s0  }
  0x3c   : > { %s2634_s1 = sld [smem:[#allocation26_spill]]  ;;  %s373_s3 = scalar_lea.vmem [#allocation7], %s2255_s11 }
  0x3d   : > { %s380_s7 = sshll.u32 %s373_s3, 4  ;;  %s371_s21 = scalar_lea.sflag [#allocation8], %s370_s30  ;;  %s381_s7 = int_to_ptr.vmem [resolvable:$true] %s380_s7 }
  0x3e   : > { %s2295_s16 = sand.u32 (!%p2237_p0), 1, %s2044_s17  }
  0x3f   : > { %s1466_s0 = sshll.u32 (!%p2237_p0), %s2295_s16, 5  ;;  %s392_s4 = scalar_lea.sflag (!%p2237_p0), [#allocation5], %s2295_s16 }
  0x40   : > { %389 = sbr.rel (%p2237_p0) target bundleno = 2432 (0x980), region = 56  ;;  %s2299_s6 = scalar_lea.vmem (!%p2237_p0), [#allocation4], %s1466_s0 }
  0x42   : > { %s376_s8 = scalar_lea.hbm %s2634_s1, %s2064_s22 }
  0x43   : > { %s378_s28 = sshll.u32 %s376_s8, 4  ;;  %s379_s28 = int_to_ptr.hbm [resolvable:$true] %s378_s28 }
  0x44   : > { %1644 = dma.hbm_to_vmem [thread:$0]  (!%p2248_p7), %s379_s28, 16, %s381_s7, %s371_s21  }
  0x45   : > { %2007 = dma.done.wait (%p2217_p6), %s392_s4, 512  }
  0x46   : > { %2009 = vsyncadd (%p2217_p6), %s392_s4, 4294966784  ;;  %s401_s3 = sand.u32 1, %s2199_s24   ;;  %s404_s20 = scalar_lea.vmem [#allocation7], %s2295_s16 }
  0x47   : > { %s402_s8 = scalar_lea.sflag [#allocation8], %s401_s3 }
  0x48   : > { %2011 = dma.done.wait (%p2217_p6), %s402_s8, 16  }
  0x49   : > { %2013 = vsyncadd (%p2217_p6), %s402_s8, 4294967280 }
  0x4a   : > { %2015 = dma.done.wait (%p66_p3), [#allocation8], 128  }
  0x4b   : > { %2017 = vsyncadd (%p66_p3), [#allocation8], 4294967168  ;;  %s2316_s26 = sand.u32 1, %s2032_s14   ;;  %p1470_p13 = scmp.ne.s32.totalorder %s2052_s19, 0 }
  0x4c   : > { %s1468_s11 = sshll.u32 %s2316_s26, 4  ;;  %s1469_s12 = sshll.u32 %s2316_s26, 3 }
  0x4d   : > { %s2320_s13 = scalar_lea.vmem [#allocation10], %s1468_s11  ;;  %s2322_s30 = scalar_lea.vmem [#allocation11], %s1469_s12 }
  0x4e   : > { %462 = sbr.rel (%p1470_p13) target bundleno = 232 (0xe8), region = 72  ;;  %s2635_s2 = sld [smem:[#allocation27_spill]] (!%p1470_p13) }
  0x4f   : > { %s2636_s3 = sld [smem:[#allocation28_spill]] (!%p1470_p13) }
  0x53   : > { %v463_v4 = vld [vmem:[%s2299_s6] sm:$0xff]  ;;  %v464_v5 = vld [vmem:[%s2299_s6 + $0x8] sm:$0xff]  ;;  %v509_v6 = vld [vmem:[%s2299_s6 + $0x10] sm:$0xff]  ;;  %vm486_vm0 = vcmask 261120   ;;  %vm506_vm1 = vcmask 781312  }
  0x54   : > { %v1598_v0 = vld [vmem:[%s2635_s2 + $0x8] sm:$0xff]  ;;  %v1597_v2 = vld [vmem:[%s2635_s2] sm:$0xff]  ;;  %v510_v7 = vld [vmem:[%s2299_s6 + $0x18] sm:$0xff]  ;;  %v465_v8 = vpack.c.bf16 %v464_v5, %v463_v4 }
  0x55   : > { %v1600_v1 = vld [vmem:[%s2635_s2 + $0x8] sm:$0xff]  ;;  %v1599_v3 = vld [vmem:[%s2635_s2] sm:$0xff]  ;;  %496 = vmatpush.bf16.msra.mxu0 %v1598_v0  ;;  %v511_v9 = vpack.c.bf16 %v510_v7, %v509_v6 }
  0x56   : > { %541 = vmatpush.bf16.msra.mxu1 %v1600_v1  ;;  %v1764_v10 = vld [vmem:[%s2636_s3] ss:$0 sm:$0xff] }
  0x57   : > { %v1765_v11 = vld [vmem:[%s2636_s3] ss:$0 sm:$0xff] }
  0x59   : > { %497 = vmatpush.bf16.msra.mxu0 %v1597_v2 }
  0x5a   : > { %542 = vmatpush.bf16.msra.mxu1 %v1599_v3 }
  0x5c   : > { %1479 = vmatmul.msk.bf16.vlgmr.msra.gmra.mxu0 %vm486_vm0, %v465_v8 }
  0x5d   : > { %1488 = vmatmul.msk.bf16.vlgmr.msra.gmra.mxu1 %vm486_vm0, %v511_v9 }
  0xd9   : > { %v499_v12 = vpop.f32.mrf.mxu0 }
  0xda   : > { %v544_v13 = vpop.f32.mrf.mxu1  ;;  %v500_v14 = vadd.f32 %v1764_v10, %v499_v12 }
  0xdb   : > { %v545_v15 = vadd.f32 %v1765_v11, %v544_v13 }
  0xdc   : > { %v504_v16 = vpack.c.bf16 %v500_v14, %v500_v14 }
  0xdd   : > { %v549_v17 = vpack.c.bf16 %v545_v15, %v545_v15 }
  0xde   : > { %507 = vst.msk [vmem:[#allocation2] sm:$0xf] %vm506_vm1, %v504_v16 }
  0xdf   : > { %551 = vst.msk [vmem:[#allocation2 + $0x8] sm:$0xf] %vm506_vm1, %v549_v17 }
  0xe1   : > { %v501_v18 = vpop.f32.mrf.mxu0 }
  0xe2   : > { %v546_v19 = vpop.f32.mrf.mxu1  ;;  %v502_v20 = vadd.f32 %v1764_v10, %v501_v18 }
  0xe3   : > { %v547_v21 = vadd.f32 %v1765_v11, %v546_v19 }
  0xe4   : > { %v505_v22 = vpack.c.bf16 %v502_v20, %v502_v20 }
  0xe5   : > { %v550_v23 = vpack.c.bf16 %v547_v21, %v547_v21 }
  0xe6   : > { %508 = vst.msk [vmem:[#allocation2 + $0x4] sm:$0xf] %vm506_vm1, %v505_v22 }
  0xe7   : > { %552 = vst.msk [vmem:[#allocation2 + $0xc] sm:$0xf] %vm506_vm1, %v550_v23 }
  0xe8 PF: > { %s2073_s12 = smov 96   ;;  %vm590_vm2 = vcmask 64512   ;;  %s1489_s29 = sshll.u32 %s2052_s19, 4  ;;  %v2358_v31 = vld [vmem:[%s404_s20] ss:$0 sm:$0xff]  ;;  %vm614_vm3 = vcmask 261120  }
  0xe9   : > { %s558_s27 = sshra.s32 %s1489_s29, 3  ;;  %s2074_s10 = smov 88   ;;  %vm663_vm4 = vcmask 60416   ;;  %vm1257_vm5 = vcmask 257024   ;;  %vm774_vm6 = vcmask 126016   ;;  %vm885_vm7 = vcmask 191616  }
  0xea   : > { %s1490_s24 = sshll.u32 %s558_s27, 2  ;;  %s2604_s16 = smov 64   ;;  %vm996_vm8 = vcmask 257216   ;;  %vm1179_vm0 = vcmask 523264  }
  0xeb   : > { %s2352_s25 = scalar_lea.vmem [#allocation2], %s1490_s24  ;;  %s2076_s20 = smov 120  }
  0xec   : > { %s2077_s7 = smov 80   ;;  %s2078_s28 = smov 72  }
  0xed   : > { %v1602_v25 = vld [vmem:[#allocation2] sm:$0xff]  ;;  %s2079_s21 = smov 112   ;;  %s2080_s0 = smov 104  }
  0xee   : > { %v1603_v24 = vld [vmem:[#allocation2 + $0x8] sm:$0xff]  ;;  %v1601_v30 = vld [vmem:[%s2352_s25] sm:$0xff]  ;;  %s2081_s4 = smov 56   ;;  %s2082_s8 = smov 48  }
  0xef   : > { %588 = vrot.lane.b32.xlu0 %v1603_v24, %s2073_s12  ;;  %v2362_v35 = vld [vmem:[#allocation2 + $0x8] sm:$0xff]  ;;  %v2367_v39 = vld [vmem:[#allocation2] sm:$0xff]  ;;  %s2083_s11 = smov 40   ;;  %s2085_s27 = smov 16  }
  0xf0   : > { %693 = vrot.lane.b32.xlu2 %v2362_v35, %s2074_s10  ;;  %v1604_v40 = vld [vmem:[%s2352_s25] sm:$0xff]  ;;  %v2373_v41 = vld [vmem:[#allocation2 + $0x8] sm:$0xff]  ;;  %s2086_s24 = smov 24  }
  0xf1   : > { %v2376_v42 = vld [vmem:[#allocation2] sm:$0xff]  ;;  %v2378_v43 = vld [vmem:[#allocation2 + $0x8] sm:$0xff] }
  0xf2   : > { %v2385_v57 = vld [vmem:[#allocation2] sm:$0xff] }
  0xf3   : > { %v1607_v60 = vld [vmem:[%s2352_s25] sm:$0xff] }
  0xf4   : > { %v1610_v2 = vld [vmem:[%s2352_s25] sm:$0xff]  ;;  %s2640_s25 = sld [smem:[#allocation32_spill]] }
  0xf7   : > { %586 = vrot.lane.b32.xlu0 %v1602_v25, %s2073_s12  ;;  %s2603_s12 = smov 8  }
  0xf8   : > { %691 = vrot.lane.b32.xlu2 %v2367_v39, %s2074_s10  ;;  %s1588_s10 = sshll.u32 %s2052_s19, 1 }
 0x100   : > { %640 = vrot.lane.b32.xlu2 %v1603_v24, %s2604_s16 }
 0x108   : > { %638 = vrot.lane.b32.xlu2 %v1602_v25, %s2604_s16  ;;  %s1266_s16 = scalar_lea.sflag [#allocation12], %s2316_s26 }
 0x110   : > { %804 = vrot.lane.b32.xlu2 %v2373_v41, %s2077_s7 }
 0x118   : > { %915 = vrot.lane.b32.xlu2 %v2378_v43, %s2078_s28 }
 0x120   : > { %802 = vrot.lane.b32.xlu2 %v2385_v57, %s2077_s7 }
 0x128   : > { %790 = vrot.lane.b32.xlu2 %v1607_v60, %s2079_s21 }
 0x14a   : > { %v694_v44 = vpop.permute.xlu2 %693 }
 0x14b   : > { %v702_v45 = vsel %vm590_vm2, %v694_v44, 0 }
 0x14c   : > { %710 = vmatpush.bf16.xpose.msra.mxu2 %v702_v45 }
 0x152   : > { %v692_v46 = vpop.permute.xlu2 %691 }
 0x153   : > { %v699_v47 = vsel %vm590_vm2, %v692_v46, 0 }
 0x154   : > { %711 = vmatpush.bf16.xpose.msra.mxu2 %v699_v47 }
 0x15a   : > { %v641_v56 = vpop.permute.xlu2 %640 }
 0x15b   : > { %653 = vmatpush.bf16.msra.mxu1 %v641_v56 }
 0x161   : > { %v589_v26 = vpop.permute.xlu0 %588 }
 0x162   : > { %v598_v27 = vsel %vm590_vm2, %v589_v26, 0  ;;  %v639_v61 = vpop.permute.xlu2 %638 }
 0x163   : > { %606 = vmatpush.bf16.xpose.msra.mxu0 %v598_v27  ;;  %654 = vmatpush.bf16.msra.mxu1 %v639_v61 }
 0x169   : > { %v587_v28 = vpop.permute.xlu0 %586 }
 0x16a   : > { %v595_v29 = vsel %vm590_vm2, %v587_v28, 0  ;;  %v805_v62 = vpop.permute.xlu2 %804 }
 0x16b   : > { %607 = vmatpush.bf16.xpose.msra.mxu0 %v595_v29  ;;  %v813_v5 = vsel %vm590_vm2, %v805_v62, 0 }
 0x16c   : > { %821 = vmatpush.bf16.xpose.msrb.mxu1 %v813_v5 }
 0x172   : > { %1503 = vmatmul.msk.bf16.vlgmr.msra.gmra.mxu0 %vm590_vm2, %v1601_v30  ;;  %v916_v0 = vpop.permute.xlu2 %915 }
 0x173   : > { %v924_v1 = vsel %vm590_vm2, %v916_v0, 0 }
 0x174   : > { %932 = vmatpush.bf16.xpose.msrb.mxu0 %v924_v1 }
 0x17a   : > { %v803_v6 = vpop.permute.xlu2 %802 }
 0x17b   : > { %v810_v7 = vsel %vm590_vm2, %v803_v6, 0 }
 0x17c   : > { %822 = vmatpush.bf16.xpose.msrb.mxu1 %v810_v7 }
 0x182   : > { %v791_v16 = vpop.permute.xlu2 %790 }
 0x1ef   : > { %v609_v32 = vpop.f32.mrf.mxu0 }
 0x1f0   : > { %v610_v33 = vadd.f32 %v2358_v31, %v609_v32 }
 0x1f2   : > { %v615_v34 = vsel %vm614_vm3, %v610_v33, -inf }
 0x1f3   : > { %616 = vmax.xlane.f32.xlu1 %v615_v34 }
 0x1f7   : > { %v611_v36 = vpop.f32.mrf.mxu0 }
 0x1f8   : > { %v612_v37 = vadd.f32 %v2358_v31, %v611_v36 }
 0x1fa   : > { %v618_v38 = vsel %vm614_vm3, %v612_v37, -inf }
 0x1fb   : > { %619 = vmax.xlane.f32.xlu1 %v618_v38 }
 0x214   : > { %679 = vrot.lane.b32.xlu1 %v1604_v40, %s2076_s20  ;;  %s2637_s20 = sld [smem:[#allocation29_spill]] }
 0x21a   : > { %s2638_s7 = smov %s2637_s20 }
 0x21c   : > { %913 = vrot.lane.b32.xlu1 %v2376_v42, %s2078_s28 }
 0x266   : > { %v617_v48 = vpop.xlane.xlu1 %616 }
 0x267   : > { %v621_v49 = vsub.f32 %v610_v33, %v617_v48 }
 0x269   : > { %v623_v50 = vmul.f32 1.442695, %v621_v49 }
 0x26b   : > { %1774 = vpow2.f32 %v623_v50 }
 0x26e   : > { %v620_v51 = vpop.xlane.xlu1 %619 }
 0x26f   : > { %v622_v52 = vsub.f32 %v612_v37, %v620_v51 }
 0x271   : > { %v1775_v53 = vpop.eup %1774  ;;  %v625_v54 = vmul.f32 1.442695, %v622_v52 }
 0x272   : > { %v627_v55 = vsel %vm614_vm3, %v1775_v53, 0.0 }
 0x273   : > { %1776 = vpow2.f32 %v625_v54  ;;  %628 = vadd.xlane.f32.xlu0 %v627_v55 }
 0x279   : > { %v1777_v58 = vpop.eup %1776 }
 0x27a   : > { %v630_v59 = vsel %vm614_vm3, %v1777_v58, 0.0 }
 0x27b   : > { %631 = vadd.xlane.f32.xlu1 %v630_v59 }
 0x286   : > { %v680_v63 = vpop.permute.xlu1 %679 }
 0x287   : > { %1517 = vmatmul.msk.bf16.vlgmr.msra.gmra.mxu2 %vm590_vm2, %v680_v63 }
 0x28e   : > { %v914_v3 = vpop.permute.xlu1 %913 }
 0x28f   : > { %v921_v4 = vsel %vm590_vm2, %v914_v3, 0 }
 0x290   : > { %933 = vmatpush.bf16.xpose.msrb.mxu0 %v921_v4 }
 0x294   : > { %901 = vrot.lane.b32.xlu1 %v1610_v2, %s2080_s0  ;;  %s554_s0 = scalar_lea.vmem %s2299_s6, %s1489_s29 [#allocation4]  ;;  %s2644_s29 = sld [smem:[#allocation35_spill]] }
 0x2e6   : > { %v629_v8 = vpop.xlane.xlu0 %628 }
 0x2e7   : > { %1778 = vrcp.f32 %v629_v8 }
 0x2ed   : > { %v1779_v10 = vpop.eup %1778 }
 0x2ee   : > { %v632_v9 = vpop.xlane.xlu1 %631  ;;  %v2396_v12 = vmul.f32 %v1779_v10, %v1775_v53 }
 0x2ef   : > { %1780 = vrcp.f32 %v632_v9 }
 0x2f5   : > { %v1781_v11 = vpop.eup %1780 }
 0x2f6   : > { %v2398_v13 = vmul.f32 %v1781_v11, %v1777_v58 }
 0x2f8   : > { %v637_v14 = vpack.c.bf16 %v2398_v13, %v2396_v12 }
 0x2fa   : > { %1504 = vmatmul.msk.bf16.vlgmr.msra.gmra.mxu1 %vm614_vm3, %v637_v14 }
 0x306   : > { %v902_v15 = vpop.permute.xlu1 %901 }
 0x307   : > { %1545 = vmatmul.msk.bf16.vlgmr.msrb.gmra.mxu0 %vm590_vm2, %v902_v15 }
 0x30a   : > { %v713_v17 = vpop.f32.mrf.mxu2  ;;  %1531 = vmatmul.msk.bf16.vlgmr.msrb.gmra.mxu1 %vm590_vm2, %v791_v16 }
 0x30b   : > { %v714_v18 = vadd.f32 %v2358_v31, %v713_v17 }
 0x30d   : > { %v718_v19 = vsel %vm614_vm3, %v714_v18, -inf }
 0x30e   : > { %719 = vmax.xlane.f32.xlu0 %v718_v19 }
 0x312   : > { %v715_v20 = vpop.f32.mrf.mxu2 }
 0x313   : > { %v716_v21 = vadd.f32 %v2358_v31, %v715_v20 }
 0x315   : > { %v721_v22 = vsel %vm614_vm3, %v716_v21, -inf }
 0x316   : > { %722 = vmax.xlane.f32.xlu2 %v721_v22 }
 0x32e   : > { %743 = vrot.lane.b32.xlu2 %v2362_v35, %s2081_s4 }
 0x336   : > { %854 = vrot.lane.b32.xlu2 %v2373_v41, %s2082_s8 }
 0x33e   : > { %852 = vrot.lane.b32.xlu2 %v2385_v57, %s2082_s8 }
 0x346   : > { %963 = vrot.lane.b32.xlu2 %v2376_v42, %s2083_s11 }
 0x377   : > { %v656_v23 = vpop.f32.mrf.mxu1 }
 0x378   : > { %v661_v24 = vpack.c.bf16 %v656_v23, %v656_v23 }
 0x37a   : > { %664 = vst.msk [vmem:[#allocation3] sm:$0xf] %vm663_vm4, %v661_v24 }
 0x37f   : > { %v658_v25 = vpop.f32.mrf.mxu1 }
 0x380   : > { %v662_v26 = vpack.c.bf16 %v658_v25, %v658_v25 }
 0x381   : > { %v720_v27 = vpop.xlane.xlu0 %719 }
 0x382   : > { %665 = vst.msk [vmem:[#allocation3 + $0x4] sm:$0xf] %vm663_vm4, %v662_v26  ;;  %v724_v30 = vsub.f32 %v714_v18, %v720_v27 }
 0x384   : > { %v935_v28 = vpop.f32.mrf.mxu0  ;;  %v726_v36 = vmul.f32 1.442695, %v724_v30 }
 0x385   : > { %v936_v29 = vadd.f32 %v2358_v31, %v935_v28 }
 0x386   : > { %1782 = vpow2.f32 %v726_v36 }
 0x387   : > { %v824_v32 = vpop.f32.mrf.mxu1  ;;  %v940_v33 = vsel %vm614_vm3, %v936_v29, -inf }
 0x388   : > { %v825_v34 = vadd.f32 %v2358_v31, %v824_v32  ;;  %941 = vmax.xlane.f32.xlu0 %v940_v33 }
 0x389   : > { %v723_v37 = vpop.xlane.xlu2 %722 }
 0x38a   : > { %v829_v35 = vsel %vm614_vm3, %v825_v34, -inf  ;;  %v725_v44 = vsub.f32 %v716_v21, %v723_v37 }
 0x38b   : > { %830 = vmax.xlane.f32.xlu1 %v829_v35 }
 0x38c   : > { %v937_v38 = vpop.f32.mrf.mxu0  ;;  %v728_v46 = vmul.f32 1.442695, %v725_v44  ;;  %v1783_v47 = vpop.eup %1782 }
 0x38d   : > { %v938_v40 = vadd.f32 %v2358_v31, %v937_v38  ;;  %v730_v48 = vsel %vm614_vm3, %v1783_v47, 0.0 }
 0x38e   : > { %1784 = vpow2.f32 %v728_v46 }
 0x38f   : > { %v943_v45 = vsel %vm614_vm3, %v938_v40, -inf  ;;  %v826_v51 = vpop.f32.mrf.mxu1 }
 0x390   : > { %944 = vmax.xlane.f32.xlu0 %v943_v45  ;;  %v827_v52 = vadd.f32 %v2358_v31, %v826_v51 }
 0x392   : > { %v832_v53 = vsel %vm614_vm3, %v827_v52, -inf }
 0x394   : > { %v1785_v49 = vpop.eup %1784 }
 0x395   : > { %v733_v50 = vsel %vm614_vm3, %v1785_v49, 0.0 }
 0x398   : > { %731 = vadd.xlane.f32.xlu0 %v730_v48 }
 0x3a0   : > { %734 = vadd.xlane.f32.xlu0 %v733_v50 }
 0x3a8   : > { %833 = vmax.xlane.f32.xlu0 %v832_v53 }
 0x3bc   : > { %741 = vrot.lane.b32.xlu0 %v2367_v39, %s2081_s4  ;;  %v744_v39 = vpop.permute.xlu2 %743  ;;  %s2639_s4 = sld [smem:[#allocation30_spill]] }
 0x3bd   : > { %756 = vmatpush.bf16.msra.mxu3 %v744_v39 }
 0x3c4   : > { %v855_v17 = vpop.permute.xlu2 %854 }
 0x3cc   : > { %v853_v20 = vpop.permute.xlu2 %852 }
 0x3fb   : > { %v942_v54 = vpop.xlane.xlu0 %941 }
 0x3fc   : > { %v946_v55 = vsub.f32 %v936_v29, %v942_v54 }
 0x3fe   : > { %v948_v56 = vmul.f32 1.442695, %v946_v55  ;;  %v831_v58 = vpop.xlane.xlu1 %830 }
 0x3ff   : > { %v835_v31 = vsub.f32 %v825_v34, %v831_v58 }
 0x400   : > { %1786 = vpow2.f32 %v948_v56 }
 0x401   : > { %v837_v59 = vmul.f32 1.442695, %v835_v31 }
 0x403   : > { %v945_v60 = vpop.xlane.xlu0 %944  ;;  %1788 = vpow2.f32 %v837_v59 }
 0x404   : > { %v947_v61 = vsub.f32 %v938_v40, %v945_v60 }
 0x406   : > { %v1787_v62 = vpop.eup %1786  ;;  %v950_v41 = vmul.f32 1.442695, %v947_v61 }
 0x407   : > { %v952_v57 = vsel %vm614_vm3, %v1787_v62, 0.0 }
 0x408   : > { %1790 = vpow2.f32 %v950_v41  ;;  %953 = vadd.xlane.f32.xlu1 %v952_v57  ;;  %v1614_v41 = vld [vmem:[%s2638_s7] sm:$0xff] }
 0x409   : > { %v1789_v42 = vpop.eup %1788 }
 0x40a   : > { %v841_v2 = vsel %vm614_vm3, %v1789_v42, 0.0 }
 0x40b   : > { %v732_v63 = vpop.xlane.xlu0 %731 }
 0x40e   : > { %v1791_v0 = vpop.eup %1790 }
 0x40f   : > { %v955_v1 = vsel %vm614_vm3, %v1791_v0, 0.0 }
 0x410   : > { %956 = vadd.xlane.f32.xlu0 %v955_v1  ;;  %842 = vadd.xlane.f32.xlu1 %v841_v2  ;;  %v555_v2 = vld [vmem:[%s554_s0] sm:$0xff] }
 0x413   : > { %v735_v3 = vpop.xlane.xlu0 %734 }
 0x41b   : > { %v834_v4 = vpop.xlane.xlu0 %833 }
 0x41c   : > { %v836_v5 = vsub.f32 %v827_v52, %v834_v4 }
 0x41e   : > { %v839_v6 = vmul.f32 1.442695, %v836_v5 }
 0x420   : > { %1792 = vpow2.f32 %v839_v6 }
 0x421   : > { %1794 = vrcp.f32 %v735_v3 }
 0x422   : > { %1796 = vrcp.f32 %v732_v63 }
 0x426   : > { %v1793_v7 = vpop.eup %1792 }
 0x427   : > { %v844_v8 = vsel %vm614_vm3, %v1793_v7, 0.0  ;;  %v1795_v9 = vpop.eup %1794 }
 0x428   : > { %845 = vadd.xlane.f32.xlu1 %v844_v8  ;;  %v1797_v10 = vpop.eup %1796  ;;  %v739_v11 = vmul.f32 %v1795_v9, %v1785_v49 }
 0x429   : > { %v738_v15 = vmul.f32 %v1797_v10, %v1783_v47  ;;  %v964_v47 = vpop.permute.xlu2 %963 }
 0x42a   : > { %v778_v34 = vadd.f32 %v739_v11, %v2398_v13 }
 0x42b   : > { %v740_v16 = vpack.c.bf16 %v739_v11, %v738_v15  ;;  %v777_v23 = vadd.f32 %v738_v15, %v2396_v12  ;;  %v2087_v11 = vmov 32.0  }
 0x42e   : > { %v742_v14 = vpop.permute.xlu0 %741 }
 0x42f   : > { %757 = vmatpush.bf16.msra.mxu3 %v742_v14 }
 0x432   : > { %1518 = vmatmul.msk.bf16.vlgmr.msra.gmra.mxu3 %vm614_vm3, %v740_v16 }
 0x433   : > { %867 = vmatpush.bf16.msrb.mxu3 %v855_v17 }
 0x437   : > { %868 = vmatpush.bf16.msrb.mxu3 %v853_v20 }
 0x441   : > { %965 = vrot.lane.b32.xlu1 %v2378_v43, %s2083_s11  ;;  %s2641_s11 = sld [smem:[#allocation31_spill]] }
 0x47b   : > { %v954_v18 = vpop.xlane.xlu1 %953 }
 0x47c   : > { %1798 = vrcp.f32 %v954_v18 }
 0x482   : > { %v1799_v21 = vpop.eup %1798 }
 0x483   : > { %v843_v19 = vpop.xlane.xlu1 %842  ;;  %v960_v25 = vmul.f32 %v1799_v21, %v1787_v62  ;;  %v957_v29 = vpop.xlane.xlu0 %956  ;;  %v1615_v62 = vld [vmem:[%s2637_s20 + $0x8] sm:$0xff] }
 0x484   : > { %1800 = vrcp.f32 %v843_v19  ;;  %1035 = vmatpush.bf16.msra.mxu1 %v1615_v62 }
 0x485   : > { %1802 = vrcp.f32 %v957_v29  ;;  %v1617_v29 = vld [vmem:[%s2639_s4 + $0x8] sm:$0xff] }
 0x486   : > { %1134 = vmatpush.bf16.msra.mxu3 %v1617_v29 }
 0x488   : > { %1036 = vmatpush.bf16.msra.mxu1 %v1614_v41  ;;  %v1621_v41 = vld [vmem:[%s2640_s25 + $0x18] sm:$0xff] }
 0x489   : > { %1187 = vmatpush.bf16.msra.mxu0 %v1621_v41 }
 0x48a   : > { %v1801_v22 = vpop.eup %1800 }
 0x48b   : > { %v849_v24 = vmul.f32 %v1801_v22, %v1789_v42  ;;  %v1803_v32 = vpop.eup %1802 }
 0x48c   : > { %v961_v12 = vmul.f32 %v1803_v32, %v1791_v0  ;;  %v1767_v0 = vld [vmem:[#allocation9] ss:$0 sm:$0xff] }
 0x48d   : > { %v888_v26 = vadd.f32 %v849_v24, %v777_v23 }
 0x48e   : > { %v962_v13 = vpack.c.bf16 %v961_v12, %v960_v25 }
 0x48f   : > { %v999_v27 = vadd.f32 %v960_v25, %v888_v26 }
 0x491   : > { %v1253_v28 = vmul.f32 0.25, %v999_v27 }
 0x493   : > { %v1255_v43 = vpack.c.bf16 %v1253_v28, %v1253_v28 }
 0x495   : > { %1258 = vst.msk [vmem:[%s2322_s30] sm:$0xf] %vm1257_vm5, %v1255_v43 }
 0x49b   : > { %v846_v30 = vpop.xlane.xlu1 %845 }
 0x49c   : > { %1804 = vrcp.f32 %v846_v30 }
 0x49d   : > { %1806 = vrcp.f32 %v2087_v11 }
 0x4a2   : > { %v1805_v33 = vpop.eup %1804 }
 0x4a3   : > { %v850_v36 = vmul.f32 %v1805_v33, %v1793_v7  ;;  %v556_v7 = vld [vmem:[%s554_s0 + $0x8] sm:$0xff]  ;;  %v1807_v14 = vpop.eup %1806 }
 0x4a4   : > { %v1054_v15 = vmul.f32 32.0, %v1807_v14  ;;  %vm1058_vm9 = vweird.f32 %v1807_v14 }
 0x4a5   : > { %v889_v35 = vadd.f32 %v850_v36, %v778_v34  ;;  %v851_v37 = vpack.c.bf16 %v850_v36, %v849_v24  ;;  %v1616_v34 = vld [vmem:[%s2639_s4] sm:$0xff] }
 0x4a6   : > { %v1055_v16 = vsub.f32 1.0, %v1054_v15  ;;  %1135 = vmatpush.bf16.msra.mxu3 %v1616_v34 }
 0x4a7   : > { %v1000_v38 = vadd.f32 %v961_v12, %v889_v35  ;;  %1532 = vmatmul.msk.bf16.vlgmr.msrb.gmra.mxu3 %vm614_vm3, %v851_v37 }
 0x4a8   : > { %v1056_v17 = vmul.f32 %v1807_v14, %v1055_v16 }
 0x4a9   : > { %v1254_v40 = vmul.f32 0.25, %v1000_v38 }
 0x4aa   : > { %v1057_v18 = vadd.f32 %v1807_v14, %v1056_v17 }
 0x4ab   : > { %v1256_v44 = vpack.c.bf16 %v1254_v40, %v1254_v40 }
 0x4ac   : > { %v2456_v19 = vsel %vm1058_vm9, %v1807_v14, %v1057_v18 }
 0x4ad   : > { %1259 = vst.msk [vmem:[%s2322_s30 + $0x4] sm:$0xf] %vm1257_vm5, %v1256_v44 }
 0x4b3   : > { %v966_v45 = vpop.permute.xlu1 %965 }
 0x4b4   : > { %978 = vmatpush.bf16.msrb.mxu2 %v966_v45 }
 0x4b5   : > { %v759_v46 = vpop.f32.mrf.mxu3 }
 0x4b6   : > { %v764_v48 = vpack.c.bf16 %v759_v46, %v759_v46 }
 0x4b8   : > { %768 = vrot.lane.b32.xlu2 %v764_v48, %s2603_s12  ;;  %979 = vmatpush.bf16.msrb.mxu2 %v964_v47 }
 0x4bb   : > { %1546 = vmatmul.msk.bf16.vlgmr.msrb.gmra.mxu2 %vm614_vm3, %v962_v13 }
 0x4bd   : > { %v761_v49 = vpop.f32.mrf.mxu3 }
 0x4be   : > { %v765_v50 = vpack.c.bf16 %v761_v49, %v761_v49 }
 0x4c0   : > { %770 = vrot.lane.b32.xlu1 %v765_v50, %s2603_s12 }
 0x512   : > { %v769_v51 = vpop.permute.xlu2 %768 }
 0x513   : > { %775 = vst.msk [vmem:[#allocation3] sm:$0xf] %vm774_vm6, %v769_v51 }
 0x52a   : > { %v870_v52 = vpop.f32.mrf.mxu3 }
 0x52b   : > { %v875_v53 = vpack.c.bf16 %v870_v52, %v870_v52  ;;  %v1768_v52 = vld [vmem:[#allocation9 + $0x1] ss:$0 sm:$0xff] }
 0x52d   : > { %879 = vrot.lane.b32.xlu2 %v875_v53, %s2085_s27 }
 0x532   : > { %v872_v54 = vpop.f32.mrf.mxu3  ;;  %v771_v55 = vpop.permute.xlu1 %770 }
 0x533   : > { %v876_v56 = vpack.c.bf16 %v872_v54, %v872_v54  ;;  %776 = vst.msk [vmem:[#allocation3 + $0x4] sm:$0xf] %vm774_vm6, %v771_v55 }
 0x535   : > { %881 = vrot.lane.b32.xlu1 %v876_v56, %s2085_s27  ;;  %v1769_v56 = vld [vmem:[#allocation9 + $0x2] ss:$0 sm:$0xff]  ;;  %s2642_s27 = sld [smem:[#allocation19_spill]] }
 0x53b   : > { %s1589_s20 = sshll.u32 %s2642_s27, 2 }
 0x53c   : > { %s2498_s28 = sadd.s32 %s1589_s20, %s1588_s10  ;;  %s1926_s10 = scalar_lea.hbm %s2644_s29, 32 }
 0x53d   : > { %s1593_s21 = sshll.u32 %s2498_s28, 2 }
 0x53e   : > { %v981_v58 = vpop.f32.mrf.mxu2  ;;  %s1298_s8 = scalar_lea.hbm %s2644_s29, %s1593_s21 }
 0x53f   : > { %v986_v31 = vpack.c.bf16 %v981_v58, %v981_v58  ;;  %s1301_s12 = sshll.u32 %s1298_s8, 4  ;;  %s1302_s12 = int_to_ptr.hbm [resolvable:$true] %s1301_s12 }
 0x540   : > { %s1920_s1 = sshra.s32 %s1302_s12, 4  ;;  %s1921_s1 = int_to_ptr.hbm [resolvable:$true] %s1920_s1 }
 0x541   : > { %990 = vrot.lane.b32.xlu0 %v986_v31, %s2086_s24  ;;  %s1922_s2 = scalar_lea.hbm %s1921_s1, 8  ;;  %p1927_p1 = scmp.lt.s32.totalorder %s1921_s1, %s2644_s29 }
 0x542   : > { %p1923_p3 = scmp.ne.s32.totalorder %s1921_s1, %s1922_s2  ;;  %p1928_p2 = scmp.lt.s32.totalorder %s1926_s10, %s1922_s2 }
 0x544   : > { %p1924_p6 = pnand %p1923_p3, %p2224_p10  ;;  %p1929_p5 = por %p1928_p2, %p1927_p1 }
 0x546   : > { %v983_v59 = vpop.f32.mrf.mxu2  ;;  %p1925_p0 = pneg %p1924_p6 }
 0x547   : > { %v987_v60 = vpack.c.bf16 %v983_v59, %v983_v59 }
 0x548   : > { %p1930_p7 = pnand %p1929_p5, %p1925_p0 }
 0x549   : > { %992 = vrot.lane.b32.xlu2 %v987_v60, %s2086_s24 }
 0x587   : > { %v880_v61 = vpop.permute.xlu2 %879 }
 0x588   : > { %886 = vst.msk [vmem:[#allocation3] sm:$0xf] %vm885_vm7, %v880_v61 }
 0x5a3   : > { %v993_v39 = vpop.permute.xlu2 %992 }
 0x5a7   : > { %v882_v57 = vpop.permute.xlu1 %881 }
 0x5a8   : > { %887 = vst.msk [vmem:[#allocation3 + $0x4] sm:$0xf] %vm885_vm7, %v882_v57  ;;  %v1620_v57 = vld [vmem:[%s2640_s25 + $0x10] sm:$0xff] }
 0x5a9   : > { %998 = vst.msk [vmem:[#allocation3 + $0x4] sm:$0xf] %vm996_vm8, %v993_v39  ;;  %1188 = vmatpush.bf16.msra.mxu0 %v1620_v57  ;;  %v1619_v39 = vld [vmem:[%s2640_s25 + $0x8] sm:$0xff] }
 0x5ad   : > { %1189 = vmatpush.bf16.msra.mxu0 %v1619_v39 }
 0x5b3   : > { %v991_v63 = vpop.permute.xlu0 %990 }
 0x5b4   : > { %997 = vst.msk [vmem:[#allocation3] sm:$0xf] %vm996_vm8, %v991_v63  ;;  %v1618_v63 = vld [vmem:[%s2640_s25] sm:$0xff] }
 0x5b5   : > { %1190 = vmatpush.bf16.msra.mxu0 %v1618_v63 }
 0x5bb   : > { %v1613_v42 = vld [vmem:[#allocation3] sm:$0xff] }
 0x5bc   : > { %1559 = vmatmul.msk.bf16.vlgmr.msra.gmra.mxu1 %vm614_vm3, %v1613_v42 }
 0x639   : > { %v1038_v1 = vpop.f32.mrf.mxu1 }
 0x63a   : > { %v1039_v3 = vadd.f32 %v1767_v0, %v1038_v1 }
 0x63c   : > { %v1043_v4 = vadd.f32 %v1039_v3, %v555_v2 }
 0x63e   : > { %v1047_v5 = vsel %vm614_vm3, %v1043_v4, 0.0 }
 0x63f   : > { %1048 = vadd.xlane.f32.xlu1 %v1047_v5 }
 0x641   : > { %v1040_v6 = vpop.f32.mrf.mxu1 }
 0x642   : > { %v1041_v8 = vadd.f32 %v1767_v0, %v1040_v6  ;;  %v1770_v0 = vld [vmem:[%s2641_s11] ss:$0 sm:$0xff]  ;;  %s1299_s11 = sshll.u32 %s2322_s30, 4  ;;  %s1300_s11 = int_to_ptr.vmem [resolvable:$true] %s1299_s11 }
 0x644   : > { %v1044_v9 = vadd.f32 %v1041_v8, %v556_v7  ;;  %v1771_v7 = vld [vmem:[#allocation9 + $0x3] ss:$0 sm:$0xff] }
 0x646   : > { %v1050_v10 = vsel %vm614_vm3, %v1044_v9, 0.0 }
 0x647   : > { %1051 = vadd.xlane.f32.xlu2 %v1050_v10 }
 0x6b2   : > { %v1049_v20 = vpop.xlane.xlu1 %1048 }
 0x6b3   : > { %v1060_v21 = vmul.f32 %v2456_v19, %v1049_v20 }
 0x6b5   : > { %v1062_v22 = vsub.f32 %v1043_v4, %v1060_v21 }
 0x6b7   : > { %v1064_v23 = vmul.f32 %v1062_v22, %v1062_v22 }
 0x6b9   : > { %v1066_v24 = vsel %vm614_vm3, %v1064_v23, 0.0 }
 0x6ba   : > { %v1052_v25 = vpop.xlane.xlu2 %1051  ;;  %1067 = vadd.xlane.f32.xlu0 %v1066_v24 }
 0x6bb   : > { %v1061_v26 = vmul.f32 %v2456_v19, %v1052_v25 }
 0x6bd   : > { %v1063_v27 = vsub.f32 %v1044_v9, %v1061_v26 }
 0x6bf   : > { %v1065_v28 = vmul.f32 %v1063_v27, %v1063_v27 }
 0x6c1   : > { %v1069_v43 = vsel %vm614_vm3, %v1065_v28, 0.0 }
 0x6c2   : > { %1070 = vadd.xlane.f32.xlu1 %v1069_v43 }
 0x72d   : > { %v1068_v30 = vpop.xlane.xlu0 %1067 }
 0x72e   : > { %v1072_v32 = vmul.f32 %v1068_v30, %v2456_v19 }
 0x730   : > { %v1074_v33 = vadd.f32 1e-05, %v1072_v32 }
 0x732   : > { %1808 = vrsqrt.f32 %v1074_v33  ;;  %vm1082_vm11 = vweird.f32 %v1074_v33 }
 0x735   : > { %v1071_v36 = vpop.xlane.xlu1 %1070 }
 0x736   : > { %v1073_v12 = vmul.f32 %v1071_v36, %v2456_v19 }
 0x738   : > { %v1809_v35 = vpop.eup %1808  ;;  %v1075_v37 = vadd.f32 1e-05, %v1073_v12 }
 0x739   : > { %v1077_v38 = vmul.f32 %v1809_v35, %v1074_v33  ;;  %vm1083_vm10 = vweird.f32 %v1809_v35 }
 0x73a   : > { %1810 = vrsqrt.f32 %v1075_v37  ;;  %vm1084_vm12 = vmor %vm1082_vm11, %vm1083_vm10  ;;  %vm1092_vm14 = vweird.f32 %v1075_v37 }
 0x73b   : > { %v1078_v40 = vmul.f32 %v1809_v35, %v1077_v38 }
 0x73d   : > { %v1079_v44 = vmul.f32 0.5, %v1078_v40 }
 0x73f   : > { %v1080_v45 = vsub.f32 1.5, %v1079_v44 }
 0x740   : > { %v1811_v46 = vpop.eup %1810 }
 0x741   : > { %v1081_v47 = vmul.f32 %v1809_v35, %v1080_v45  ;;  %v1087_v48 = vmul.f32 %v1811_v46, %v1075_v37  ;;  %vm1093_vm13 = vweird.f32 %v1811_v46 }
 0x742   : > { %vm1094_vm15 = vmor %vm1092_vm14, %vm1093_vm13 }
 0x743   : > { %v1088_v13 = vmul.f32 %v1811_v46, %v1087_v48  ;;  %v1085_v49 = vsel %vm1084_vm12, %v1809_v35, %v1081_v47 }
 0x744   : > { %v1096_v53 = vmul.f32 %v1085_v49, %v1062_v22 }
 0x745   : > { %v1089_v50 = vmul.f32 0.5, %v1088_v13 }
 0x746   : > { %v1099_v58 = vmul.f32 %v1768_v52, %v1096_v53 }
 0x747   : > { %v1090_v51 = vsub.f32 1.5, %v1089_v50 }
 0x748   : > { %v1102_v60 = vadd.f32 %v1769_v56, %v1099_v58 }
 0x749   : > { %v1091_v54 = vmul.f32 %v1811_v46, %v1090_v51 }
 0x74b   : > { %v1095_v55 = vsel %vm1094_vm15, %v1811_v46, %v1091_v54 }
 0x74c   : > { %v1097_v31 = vmul.f32 %v1095_v55, %v1063_v27 }
 0x74e   : > { %v1100_v59 = vmul.f32 %v1768_v52, %v1097_v31 }
 0x750   : > { %v1103_v61 = vadd.f32 %v1769_v56, %v1100_v59 }
 0x752   : > { %v1104_v62 = vpack.c.bf16 %v1103_v61, %v1102_v60 }
 0x754   : > { %1568 = vmatmul.msk.bf16.vlgmr.msra.gmra.mxu3 %vm614_vm3, %v1104_v62 }
 0x7d7   : > { %v1137_v42 = vpop.f32.mrf.mxu3 }
 0x7d8   : > { %v1138_v1 = vadd.f32 %v1770_v0, %v1137_v42 }
 0x7da   : > { %v1142_v4 = vmax.f32 %v1138_v1, 0.0 }
 0x7df   : > { %v1139_v2 = vpop.f32.mrf.mxu3 }
 0x7e0   : > { %v1140_v3 = vadd.f32 %v1770_v0, %v1139_v2 }
 0x7e2   : > { %v1143_v5 = vmax.f32 %v1140_v3, 0.0 }
 0x7e4   : > { %v1144_v6 = vpack.c.bf16 %v1143_v5, %v1142_v4 }
 0x7e6   : > { %1585 = vmatmul.msk.bf16.vlgmr.msra.gmra.mxu0 %vm1179_vm0, %v1144_v6 }
 0x863   : > { %v1192_v8 = vpop.f32.mrf.mxu0 }
 0x864   : > { %v1193_v9 = vadd.f32 %v1771_v7, %v1192_v8 }
 0x866   : > { %v1197_v10 = vadd.f32 %v1193_v9, %v1102_v60 }
 0x868   : > { %v1201_v11 = vsel %vm614_vm3, %v1197_v10, 0.0 }
 0x869   : > { %1202 = vadd.xlane.f32.xlu2 %v1201_v11 }
 0x86b   : > { %v1194_v14 = vpop.f32.mrf.mxu0 }
 0x86c   : > { %v1195_v15 = vadd.f32 %v1771_v7, %v1194_v14 }
 0x86e   : > { %v1198_v16 = vadd.f32 %v1195_v15, %v1103_v61 }
 0x870   : > { %v1204_v17 = vsel %vm614_vm3, %v1198_v16, 0.0 }
 0x871   : > { %1205 = vadd.xlane.f32.xlu1 %v1204_v17 }
 0x8dc   : > { %v1203_v18 = vpop.xlane.xlu2 %1202 }
 0x8dd   : > { %v1207_v20 = vmul.f32 %v1203_v18, %v2456_v19 }
 0x8df   : > { %v1209_v21 = vsub.f32 %v1197_v10, %v1207_v20 }
 0x8e1   : > { %v1211_v22 = vmul.f32 %v1209_v21, %v1209_v21 }
 0x8e3   : > { %v1213_v23 = vsel %vm614_vm3, %v1211_v22, 0.0 }
 0x8e4   : > { %v1206_v24 = vpop.xlane.xlu1 %1205  ;;  %1214 = vadd.xlane.f32.xlu2 %v1213_v23 }
 0x8e5   : > { %v1208_v25 = vmul.f32 %v1206_v24, %v2456_v19 }
 0x8e7   : > { %v2491_v26 = vsub.f32 %v1198_v16, %v1208_v25 }
 0x8e9   : > { %v1212_v27 = vmul.f32 %v2491_v26, %v2491_v26 }
 0x8eb   : > { %v1216_v28 = vsel %vm614_vm3, %v1212_v27, 0.0 }
 0x8ec   : > { %1217 = vadd.xlane.f32.xlu0 %v1216_v28 }
 0x8ed   : > { %1933 = shalt.err (!%p1930_p7)
}
 0x8ee   : > { %s2088_s30 = smov 4   ;;  %s2645_s21 = smov 64   ;;  %v1772_v46 = vld [vmem:[#allocation9 + $0x4] ss:$0 sm:$0xff]  ;;  %v1773_v13 = vld [vmem:[#allocation9 + $0x5] ss:$0 sm:$0xff] }
 0x8ef   : > { %1631 = dma.vmem_to_hbm [thread:$0]  (%p2224_p10), %s1300_s11, 128, %s1302_s12, %s1266_s16, %s2645_s21, %s2645_s21, %s2088_s30  }
 0x8f0   : > { %s1590_s1 = sshll.u32 %s2498_s28, 3  ;;  %s2646_s16 = sld [smem:[#allocation34_spill]] }
 0x8f1   : > { %s1280_s6 = sshll.u32 %s2320_s13, 4  ;;  %s1261_s28 = scalar_lea.sflag [#allocation6], %s2316_s26  ;;  %s1281_s6 = int_to_ptr.vmem [resolvable:$true] %s1280_s6 }
 0x8f6   : > { %s2647_s12 = smov %s2646_s16  ;;  %s1279_s0 = scalar_lea.hbm %s2646_s16, %s1590_s1 }
 0x8f7   : > { %s1282_s8 = sshll.u32 %s1279_s0, 4  ;;  %s1954_s20 = scalar_lea.hbm %s2647_s12, 64  ;;  %s1283_s8 = int_to_ptr.hbm [resolvable:$true] %s1282_s8 }
 0x8f8   : > { %s1948_s11 = sshra.s32 %s1283_s8, 4  ;;  %s1949_s11 = int_to_ptr.hbm [resolvable:$true] %s1948_s11 }
 0x8f9   : > { %s1950_s19 = scalar_lea.hbm %s1949_s11, 16  ;;  %p1955_p11 = scmp.lt.s32.totalorder %s1949_s11, %s2647_s12 }
 0x8fa   : > { %p1951_p8 = scmp.ne.s32.totalorder %s1949_s11, %s1950_s19  ;;  %p1956_p13 = scmp.lt.s32.totalorder %s1954_s20, %s1950_s19 }
 0x8fc   : > { %p1952_p4 = pnand %p1951_p8, %p2224_p10  ;;  %p1957_p3 = por %p1956_p13, %p1955_p11 }
 0x8fe   : > { %p1953_p9 = pneg %p1952_p4 }
 0x900   : > { %p1958_p6 = pnand %p1957_p3, %p1953_p9 }
 0x957   : > { %v1215_v43 = vpop.xlane.xlu2 %1214 }
 0x958   : > { %v1219_v29 = vmul.f32 %v1215_v43, %v2456_v19 }
 0x95a   : > { %v1221_v30 = vadd.f32 1e-05, %v1219_v29 }
 0x95c   : > { %1812 = vrsqrt.f32 %v1221_v30  ;;  %vm1229_vm2 = vweird.f32 %v1221_v30 }
 0x95f   : > { %v1218_v32 = vpop.xlane.xlu0 %1217 }
 0x960   : > { %v1220_v33 = vmul.f32 %v1218_v32, %v2456_v19 }
 0x962   : > { %v1813_v34 = vpop.eup %1812  ;;  %v1222_v36 = vadd.f32 1e-05, %v1220_v33 }
 0x963   : > { %v1224_v12 = vmul.f32 %v1813_v34, %v1221_v30  ;;  %vm1230_vm1 = vweird.f32 %v1813_v34 }
 0x964   : > { %1814 = vrsqrt.f32 %v1222_v36  ;;  %vm1231_vm4 = vmor %vm1229_vm2, %vm1230_vm1  ;;  %vm1239_vm6 = vweird.f32 %v1222_v36 }
 0x965   : > { %v1225_v35 = vmul.f32 %v1813_v34, %v1224_v12 }
 0x967   : > { %v1226_v37 = vmul.f32 0.5, %v1225_v35 }
 0x969   : > { %v1227_v38 = vsub.f32 1.5, %v1226_v37 }
 0x96a   : > { %v1815_v40 = vpop.eup %1814 }
 0x96b   : > { %v1228_v44 = vmul.f32 %v1813_v34, %v1227_v38  ;;  %v1234_v45 = vmul.f32 %v1815_v40, %v1222_v36  ;;  %vm1240_vm5 = vweird.f32 %v1815_v40 }
 0x96c   : > { %vm1241_vm7 = vmor %vm1239_vm6, %vm1240_vm5 }
 0x96d   : > { %v1232_v47 = vsel %vm1231_vm4, %v1813_v34, %v1228_v44  ;;  %v1235_v48 = vmul.f32 %v1815_v40, %v1234_v45 }
 0x96e   : > { %v1243_v19 = vmul.f32 %v1232_v47, %v1209_v21 }
 0x96f   : > { %v1236_v49 = vmul.f32 0.5, %v1235_v48 }
 0x970   : > { %v1246_v50 = vmul.f32 %v1772_v46, %v1243_v19 }
 0x971   : > { %v1237_v51 = vsub.f32 1.5, %v1236_v49 }
 0x972   : > { %v1249_v52 = vadd.f32 %v1773_v13, %v1246_v50 }
 0x973   : > { %v1238_v53 = vmul.f32 %v1815_v40, %v1237_v51 }
 0x974   : > { %1251 = vst.msk [vmem:[%s2320_s13] sm:$0xff] %vm614_vm3, %v1249_v52 }
 0x975   : > { %v1242_v54 = vsel %vm1241_vm7, %v1815_v40, %v1238_v53 }
 0x976   : > { %v1244_v55 = vmul.f32 %v1242_v54, %v2491_v26 }
 0x978   : > { %v1247_v56 = vmul.f32 %v1772_v46, %v1244_v55 }
 0x97a   : > { %v1250_v58 = vadd.f32 %v1773_v13, %v1247_v56 }
 0x97c   : > { %1252 = vst.msk [vmem:[%s2320_s13 + $0x8] sm:$0xff] %vm614_vm3, %v1250_v58 }
 0x97d   : > { %1961 = shalt.err (!%p1958_p6)
}
 0x97e   : > { %s2089_s26 = smov 128   ;;  %s2648_s13 = smov 8  }
 0x97f   : > { %1630 = dma.vmem_to_hbm [thread:$0]  (%p2224_p10), %s1281_s6, 256, %s1283_s8, %s1261_s28, %s2089_s26, %s2089_s26, %s2648_s13  }
 0x980 PF: > { %s2649_s1 = sld [smem:[#allocation18_spill]]  ;;  %p1655_p0 = scmp.ge.s32.totalorder %s2068_s23, 2 }
 0x982   : > { %p1646_p1 = pnand %p1655_p0, %p2229_p12 }
 0x984   : > { %p1647_p2 = pneg %p1646_p1 }
 0x986   : > { %s1316_s3 = sand.u32 1, %s2649_s1  }
 0x987   : > { %s1317_s16 = scalar_lea.sflag [#allocation6], %s1316_s3 }
 0x988   : > { %2019 = dma.done.wait (%p1647_p2), %s1317_s16, 256  }
 0x989   : > { %2021 = vsyncadd (%p1647_p2), %s1317_s16, 4294967040  ;;  %s1327_s0 = scalar_lea.sflag [#allocation12], %s1316_s3 }
 0x98a   : > { %2023 = dma.done.wait (%p1647_p2), %s1327_s0, 128  }
 0x98b   : > { %2025 = vsyncadd (%p1647_p2), %s1327_s0, 4294967168  ;;  %s33_s23 = sadd.s32 1, %s2068_s23   ;;  %s2651_s19 = sld [smem:[#allocation20_spill]] }
 0x98c   : > { %p30_p5 = scmp.ge.s32.totalorder %s33_s23, 6   ;;  %s2652_s21 = sld [smem:[#allocation23_spill]] }
 0x98d   : > { %s2653_s24 = sld [smem:[#allocation24_spill]]  ;;  %s2654_s13 = smov %s2032_s14 }
 0x98e   : > { %s2655_s14 = smov %s2036_s15  ;;  %s2656_s15 = smov %s2279_s9 }
 0x98f   : > { %s2657_s16 = smov %s2044_s17  ;;  %s2658_s17 = smov %s2048_s18 }
 0x990   : > { %s2659_s18 = smov %s2274_s5  ;;  %s2660_s20 = smov %s2064_s22 }
 0x991   :  { %32 = sbr.rel (!%p30_p5) target bundleno = 25 (0x19), region = 141 }
 0x993   : > { %s2661_s22 = smov %s2653_s24 }
 0x996   :  { %1333 = vsyncpa [#allocation5], 1 }
 0x997   :  { %1335 = vsyncpa [#allocation5 + $0x1], 1 }
 0x998   :  { %1336 = vsyncpa [#allocation8], 1 }
 0x999   :  { %1338 = vsyncpa [#allocation8 + $0x1], 1 }
 0x99a   :  { %1339 = vsyncpa [#allocation6], 1 }
 0x99b   :  { %1341 = vsyncpa [#allocation6 + $0x1], 1 }
 0x99c   :  { %1342 = vsyncpa [#allocation12], 1 }
 0x99d   :  { %1344 = vsyncpa [#allocation12 + $0x1], 1 }

</bundles_post_ra>
